<compile_context>
chip_gen: v5e
topology: v5e:2x2
jax: 0.10.0
libtpu: 0.0.40
codegen_flags: <defaults>
</compile_context>

<pallas_src>
import jax
import jax.numpy as jnp
from jax.experimental import pallas as pl
from jax.experimental.pallas import tpu as pltpu

EPS = 1e-5


def _round_up(x, m):
    return (x + m - 1) // m * m


# ------------------------------ fused kernel -------------------------------- #

def _make_block_kernel(stride, OH, OW, S1, S2, M1, M2, MD, MID,
                       has_down, has_ident):
    """Whole BasicBlock for one image.

    src_ref holds the spatially padded, stride-phase-decomposed activation
    flattened to (stride**2, rows, Cin); every 3x3 tap is a dense shifted slice
    of one phase plane -> 9 bf16 MXU dots accumulated into an f32 scratch.
    conv1's ReLU'd bf16 output is written into the interior of a zeroed VMEM
    scratch laid out as conv2's padded input (pitch S2 = OW+2), then conv2 runs
    from that scratch.  The valid output rows are extracted densely (pitch OW)
    with the (optional) fused residual added on the way out.
    """

    def kernel(*refs):
        it = iter(refs)
        src_ref = next(it)                      # (P2, rows1, Cin)   bf16
        w1_ref = next(it)                       # (9, Cin, OCp)      bf16
        b1_ref = next(it)                       # (1, OCp)           f32
        w2_ref = next(it)                       # (9, OCp, OCp)      bf16
        b2_ref = next(it)                       # (1, OCp)           f32
        xs_ref = next(it) if has_down else None   # (MD, Cin)        bf16
        wd_ref = next(it) if has_down else None   # (Cin, OCp)       bf16
        id_ref = next(it) if has_ident else None  # (MD, OCp)        bf16
        o_ref = next(it)                        # (MD, OCp)          f32
        acc1_ref = next(it)                     # (M1, OCp)          f32 scratch
        mid_ref = next(it)                      # (MID, OCp)         bf16 scratch
        acc2_ref = next(it)                     # (M2, OCp)          f32 scratch

        OCp = o_ref.shape[-1]

        # ---- conv1: 3x3 stride-s, BN scale folded into weights, bias-initialized
        acc1_ref[...] = jnp.broadcast_to(b1_ref[...], (M1, OCp))
        for kh in range(3):
            for kw in range(3):
                phase = (kh % stride) * stride + (kw % stride)
                start = (kh // stride) * S1 + (kw // stride)
                acc1_ref[...] += jnp.dot(
                    src_ref[phase, start:start + M1, :], w1_ref[kh * 3 + kw],
                    preferred_element_type=jnp.float32)

        # ---- build conv2's zero-padded bf16 input in VMEM (never leaves chip)
        mid_ref[...] = jnp.zeros((MID, OCp), jnp.bfloat16)
        for oh in range(OH):
            y = jnp.maximum(acc1_ref[oh * S1:oh * S1 + OW, :], 0.0)   # ReLU
            dst = (oh + 1) * S2 + 1
            mid_ref[dst:dst + OW, :] = y.astype(jnp.bfloat16)

        # ---- conv2: 3x3 stride-1, BN folded, bias-initialized accumulator ----
        acc2_ref[...] = jnp.broadcast_to(b2_ref[...], (M2, OCp))
        for kh in range(3):
            for kw in range(3):
                start = kh * S2 + kw
                acc2_ref[...] += jnp.dot(
                    mid_ref[start:start + M2, :], w2_ref[kh * 3 + kw],
                    preferred_element_type=jnp.float32)

        # ---- fused 1x1-sN BN shortcut (its bias was folded into b2 outside) --
        if has_down:
            sc = jnp.dot(xs_ref[...], wd_ref[...],
                         preferred_element_type=jnp.float32)          # (MD, OCp)

        # ---- dense extraction (drop pitch-pad columns) + residual add --------
        # (BasicBlock has no ReLU after the residual add -- matches the spec.)
        for oh in range(OH):
            val = acc2_ref[oh * S2:oh * S2 + OW, :]
            if has_down:
                val = val + sc[oh * OW:(oh + 1) * OW, :]
            if has_ident:
                val = val + id_ref[oh * OW:(oh + 1) * OW, :].astype(jnp.float32)
            o_ref[oh * OW:(oh + 1) * OW, :] = val
        if MD > OH * OW:                               # pad rows (rarely needed)
            o_ref[OH * OW:MD, :] = jnp.zeros((MD - OH * OW, OCp), jnp.float32)

    return kernel


# ------------------------------- JAX glue ----------------------------------- #

def prep_src(x_nhwc, stride):
    """Pad spatially, phase-decompose for stride 2, flatten to (N*s*s, rows, C) bf16."""
    x_nhwc = x_nhwc.astype(jnp.bfloat16)
    N, H, W, C = x_nhwc.shape
    xp = jnp.pad(x_nhwc, ((0, 0), (1, 1), (1, 1), (0, 0)))
    if stride == 1:
        OH, OW = H, W
        R, S = H + 2, W + 2
        ph = xp[:, None]                                            # (N, 1, R, S, C)
    else:
        assert stride == 2 and H % 2 == 0 and W % 2 == 0
        OH, OW = H // 2, W // 2
        R, S = (H + 2) // 2, (W + 2) // 2
        ph = xp.reshape(N, R, 2, S, 2, C).transpose(0, 2, 4, 1, 3, 5)
        ph = ph.reshape(N, 4, R, S, C)                              # phases (kh%2, kw%2)
    flat = ph.reshape(N * stride * stride, R * S, C)
    flat = jnp.pad(flat, ((0, 0), (0, S), (0, 0)))                  # slack rows for tap shifts
    return flat, (OH, OW, S)


def fold_bn(bn):
    gamma, beta, mean, var = bn
    scale = gamma / jnp.sqrt(var + EPS)
    return scale, beta - mean * scale


def prep_w3x3(w_oihw, bn, ocp, cin_pad=None):
    """PyTorch (OC,C,3,3) -> (9, Cp, OCp) bf16 with BN scale folded (in f32); bias f32."""
    scale, bias = fold_bn(bn)
    OC, C, KH, KW = w_oihw.shape
    w = jnp.transpose(w_oihw, (2, 3, 1, 0)).reshape(KH * KW, C, OC) * scale[None, None, :]
    if cin_pad is not None and cin_pad > C:
        w = jnp.pad(w, ((0, 0), (0, cin_pad - C), (0, 0)))
    w = jnp.pad(w, ((0, 0), (0, 0), (0, ocp - OC)))
    return w.astype(jnp.bfloat16), jnp.pad(bias, (0, ocp - OC)).astype(jnp.float32)


def prep_w1x1(w_oihw, bn, ocp):
    scale, bias = fold_bn(bn)
    OC, C = w_oihw.shape[:2]
    w = jnp.transpose(w_oihw[:, :, 0, 0], (1, 0)) * scale[None, :]
    w = jnp.pad(w, ((0, 0), (0, ocp - OC)))
    return w.astype(jnp.bfloat16), jnp.pad(bias, (0, ocp - OC)).astype(jnp.float32)


def _vmem_estimate(shapes_dtypes):
    """Rough VMEM footprint (lane/sublane padded) of a list of (shape, dtype)."""
    total = 0
    for shape, dtype in shapes_dtypes:
        itemsize = jnp.dtype(dtype).itemsize
        last = _round_up(shape[-1], 128)
        second = _round_up(shape[-2], 8) if len(shape) >= 2 else 1
        lead = 1
        for d in shape[:-2]:
            lead *= d
        total += lead * second * last * itemsize
    return total


def basic_block_pallas(x_nchw, params, *, stride=2, downsample=1, res=0):
    x = jnp.transpose(x_nchw, (0, 2, 3, 1)).astype(jnp.float32)     # NHWC
    N, H, W, Cin = x.shape
    OC = params["w1"].shape[0]
    OCp = _round_up(OC, 128)                                        # lane-dense outputs

    # conv1 phase source (only the *input* is re-laid-out in XLA; it is the
    # smallest activation in the chain for stride-2 blocks).
    src1, (OH, OW, S1) = prep_src(x, stride)
    S2 = OW + 2                                                     # conv2 padded pitch
    M1 = OH * S1
    M2 = OH * S2
    MD = _round_up(OH * OW, 8)                                      # dense output rows/img
    MID = _round_up(M2 + 2 * S2 + 2, 8)                             # conv2 padded-src rows
    P2 = stride * stride
    rows1 = src1.shape[1]

    w1, b1 = prep_w3x3(params["w1"], params["bn1"], OCp)
    w2, b2 = prep_w3x3(params["w2"], params["bn2"], OCp, cin_pad=OCp)

    # NOTE: weight/bias BlockSpecs have constant index maps; they stay resident.
    in_specs = [
        pl.BlockSpec((P2, rows1, Cin), lambda n: (n, 0, 0)),        # phase source (1 image)
        pl.BlockSpec((9, Cin, OCp), lambda n: (0, 0, 0)),           # w1 (scale folded)
        pl.BlockSpec((1, OCp), lambda n: (0, 0)),                   # b1
        pl.BlockSpec((9, OCp, OCp), lambda n: (0, 0, 0)),           # w2 (scale folded)
        pl.BlockSpec((1, OCp), lambda n: (0, 0)),                   # b2
    ]

    has_down = False
    has_ident = False
    extra_args = []
    extra_specs = []
    if res == 1:
        if downsample == 1:
            xs = x[:, 0:OH * stride:stride, 0:OW * stride:stride, :]  # 1x1-sN sampling
            xs = xs.reshape(N, OH * OW, Cin)
            if MD > OH * OW:
                xs = jnp.pad(xs, ((0, 0), (0, MD - OH * OW), (0, 0)))
            xs = xs.reshape(N * MD, Cin).astype(jnp.bfloat16)
            wd, bd = prep_w1x1(params["wd"], params["bnd"], OCp)
            b2 = b2 + bd                                             # fold shortcut bias
            extra_args += [xs, wd]
            extra_specs += [pl.BlockSpec((MD, Cin), lambda n: (n, 0)),
                            pl.BlockSpec((Cin, OCp), lambda n: (0, 0))]
            has_down = True
        else:
            assert stride == 1 and Cin == OC, \
                "identity shortcut requires stride=1 and inplanes==out_planes"
            ident = jnp.pad(x, ((0, 0), (0, 0), (0, 0), (0, OCp - Cin)))
            ident = ident.reshape(N, H * W, OCp)
            if MD > OH * OW:
                ident = jnp.pad(ident, ((0, 0), (0, MD - OH * OW), (0, 0)))
            ident = ident.reshape(N * MD, OCp).astype(jnp.bfloat16)  # bf16 shortcut stream
            extra_args += [ident]
            extra_specs += [pl.BlockSpec((MD, OCp), lambda n: (n, 0))]
            has_ident = True

    scratch_shapes = [
        pltpu.VMEM((M1, OCp), jnp.float32),       # conv1 accumulator
        pltpu.VMEM((MID, OCp), jnp.bfloat16),     # conv2 padded input (conv1 output)
        pltpu.VMEM((M2, OCp), jnp.float32),       # conv2 accumulator
    ]

    # VMEM budget from actual buffer sizes (inputs/outputs double-buffered).
    block_list = [((P2, rows1, Cin), jnp.bfloat16), ((9, Cin, OCp), jnp.bfloat16),
                  ((1, OCp), jnp.float32), ((9, OCp, OCp), jnp.bfloat16),
                  ((1, OCp), jnp.float32), ((MD, OCp), jnp.float32)]
    if has_down:
        block_list += [((MD, Cin), jnp.bfloat16), ((Cin, OCp), jnp.bfloat16)]
    if has_ident:
        block_list += [((MD, OCp), jnp.bfloat16)]
    scratch_list = [((M1, OCp), jnp.float32), ((MID, OCp), jnp.bfloat16),
                    ((M2, OCp), jnp.float32)]
    vmem_bytes = 2 * _vmem_estimate(block_list) + _vmem_estimate(scratch_list) + (4 << 20)
    vmem_bytes = int(min(max(vmem_bytes, 32 << 20), 64 << 20))

    out = pl.pallas_call(
        _make_block_kernel(stride, OH, OW, S1, S2, M1, M2, MD, MID,
                           has_down, has_ident),
        out_shape=jax.ShapeDtypeStruct((N * MD, OCp), jnp.float32),
        grid=(N,),
        in_specs=in_specs + extra_specs,
        out_specs=pl.BlockSpec((MD, OCp), lambda n: (n, 0)),
        scratch_shapes=scratch_shapes,
        compiler_params=pltpu.CompilerParams(
            dimension_semantics=("parallel",),
            vmem_limit_bytes=vmem_bytes),
    )(src1, w1, b1.reshape(1, OCp), w2, b2.reshape(1, OCp), *extra_args)

    out = out.reshape(N, MD, OCp)[:, :OH * OW, :OC].reshape(N, OH, OW, OC)
    return jnp.transpose(out, (0, 3, 1, 2))                         # back to NCHW


# --------------------------- reference (pure JAX) --------------------------- #

def basic_block_ref(x, params, *, stride=2, downsample=1, res=0):
    def conv(y, w, s, p):
        return jax.lax.conv_general_dilated(
            y, w, (s, s), [(p, p), (p, p)],
            dimension_numbers=("NCHW", "OIHW", "NCHW"))

    def bn(y, stats):
        g, b, m, v = stats
        sh = (1, -1, 1, 1)
        return (y - m.reshape(sh)) / jnp.sqrt(v.reshape(sh) + EPS) * g.reshape(sh) + b.reshape(sh)

    out = jax.nn.relu(bn(conv(x, params["w1"], stride, 1), params["bn1"]))
    out = bn(conv(out, params["w2"], 1, 1), params["bn2"])
    if res == 1:
        sc = bn(conv(x, params["wd"], stride, 0), params["bnd"]) if downsample == 1 else x
        out = out + sc
    return out


# ------------------------------- parameters --------------------------------- #

def init_params(key, cin, cout):
    ks = jax.random.split(key, 6)

    def bn_params(k):
        k1, k2, k3, k4 = jax.random.split(k, 4)
        gamma = jax.random.uniform(k1, (cout,), minval=0.5, maxval=1.5)
        beta = jax.random.normal(k2, (cout,)) * 0.1
        mean = jax.random.normal(k3, (cout,)) * 0.1
        var = jax.random.uniform(k4, (cout,), minval=0.5, maxval=1.5)
        return gamma, beta, mean, var

    return {
        "w1": jax.random.normal(ks[0], (cout, cin, 3, 3)) * 0.1,
        "bn1": bn_params(ks[1]),
        "w2": jax.random.normal(ks[2], (cout, cout, 3, 3)) * 0.1,
        "bn2": bn_params(ks[3]),
        "wd": jax.random.normal(ks[4], (cout, cin, 1, 1)) * 0.1,
        "bnd": bn_params(ks[5]),
    }


# --------------------------------- main ------------------------------------- #

if __name__ == "__main__":
    key = jax.random.PRNGKey(0)
    k1, k2, k3, k4 = jax.random.split(key, 4)

    # Configs A/B: stride-2 block, no residual / residual with 1x1 downsample.
    N, Cin, H, W = 2, 4, 16, 16
    Cout, stride = 8, 2
    x = jax.random.normal(k1, (N, Cin, H, W), dtype=jnp.float32)
    params = init_params(k2, Cin, Cout)
    for res, downsample in ((0, 1), (1, 1)):
        out = jax.block_until_ready(
            basic_block_pallas(x, params, stride=stride, downsample=downsample, res=res))
        ref = basic_block_ref(x, params, stride=stride, downsample=downsample, res=res)
        assert out.shape == (N, Cout, H // stride, W // stride), out.shape
        # bf16 MXU operands (f32 accumulation) vs an all-f32 reference.
        if not jnp.allclose(out, ref, atol=5e-2, rtol=5e-2):
            raise AssertionError(f"mismatch (res={res}, downsample={downsample})")

    # Config C: stride-1 block with identity residual (downsample=0, Res=1).
    Cid = 8
    x2 = jax.random.normal(k3, (N, Cid, H, W), dtype=jnp.float32)
    params2 = init_params(k4, Cid, Cid)
    out2 = jax.block_until_ready(
        basic_block_pallas(x2, params2, stride=1, downsample=0, res=1))
    ref2 = basic_block_ref(x2, params2, stride=1, downsample=0, res=1)
    assert out2.shape == (N, Cid, H, W), out2.shape
    if not jnp.allclose(out2, ref2, atol=5e-2, rtol=5e-2):
        raise AssertionError("mismatch (identity residual)")

    print("KERNEL_OK")
</pallas_src>

<mosaic_0001>
module attributes {stable_mosaic.version = 11 : i64} {
  func.func @kernel(%arg0: i32, %arg1: memref<4x90x4xbf16, #tpu.memory_space<vmem>>, %arg2: memref<9x4x128xbf16, #tpu.memory_space<vmem>>, %arg3: memref<1x128xf32, #tpu.memory_space<vmem>>, %arg4: memref<9x128x128xbf16, #tpu.memory_space<vmem>>, %arg5: memref<1x128xf32, #tpu.memory_space<vmem>>, %arg6: memref<64x128xf32, #tpu.memory_space<vmem>>, %arg7: memref<72x128xf32, #tpu.memory_space<vmem>>, %arg8: memref<104x128xbf16, #tpu.memory_space<vmem>>, %arg9: memref<80x128xf32, #tpu.memory_space<vmem>>) attributes {dimension_semantics = [#tpu.dimension_semantics<parallel>], iteration_bounds = array<i64: 2>, scalar_prefetch = 0 : i64, scratch_operands = 3 : i64, tpu.core_type = #tpu.core_type<tc>, window_params = [{transform_indices = @transform_0, window_bounds = array<i64: 4, 90, 4>}, {pipeline_mode = #tpu.pipeline_mode<synchronous>, transform_indices = @transform_1, window_bounds = array<i64: 9, 4, 128>}, {pipeline_mode = #tpu.pipeline_mode<synchronous>, transform_indices = @transform_2, window_bounds = array<i64: 1, 128>}, {pipeline_mode = #tpu.pipeline_mode<synchronous>, transform_indices = @transform_3, window_bounds = array<i64: 9, 128, 128>}, {pipeline_mode = #tpu.pipeline_mode<synchronous>, transform_indices = @transform_4, window_bounds = array<i64: 1, 128>}, {transform_indices = @transform_5, window_bounds = array<i64: 64, 128>}]} {
    %c0 = arith.constant 0 : index
    %c0_0 = arith.constant 0 : index
    %0 = vector.load %arg3[%c0, %c0_0] : memref<1x128xf32, #tpu.memory_space<vmem>>, vector<1x128xf32>
    %1 = vector.shape_cast %0 : vector<1x128xf32> to vector<1x128xf32>
    %2 = vector.broadcast %1 : vector<1x128xf32> to vector<72x128xf32>
    %c0_1 = arith.constant 0 : index
    %c0_2 = arith.constant 0 : index
    %3 = vector.load %arg7[%c0_1, %c0_2] : memref<72x128xf32, #tpu.memory_space<vmem>>, vector<72x128xf32>
    tpu.vector_store %arg7[%c0_1, %c0_2], %2 {strides = array<i32>} : memref<72x128xf32, #tpu.memory_space<vmem>>, vector<72x128xf32>,
    %c0_3 = arith.constant 0 : index
    %c0_4 = arith.constant 0 : index
    %4 = vector.load %arg7[%c0_3, %c0_4] : memref<72x128xf32, #tpu.memory_space<vmem>>, vector<72x128xf32>
    %c0_5 = arith.constant 0 : index
    %c0_6 = arith.constant 0 : index
    %c0_7 = arith.constant 0 : index
    %5 = vector.load %arg1[%c0_5, %c0_6, %c0_7] : memref<4x90x4xbf16, #tpu.memory_space<vmem>>, vector<1x72x4xbf16>
    %6 = vector.shape_cast %5 : vector<1x72x4xbf16> to vector<72x4xbf16>
    %c0_8 = arith.constant 0 : index
    %c0_9 = arith.constant 0 : index
    %c0_10 = arith.constant 0 : index
    %7 = vector.load %arg2[%c0_8, %c0_9, %c0_10] : memref<9x4x128xbf16, #tpu.memory_space<vmem>>, vector<1x4x128xbf16>
    %8 = vector.shape_cast %7 : vector<1x4x128xbf16> to vector<4x128xbf16>
    %cst = arith.constant dense<0.000000e+00> : vector<72x128xf32>
    %9 = tpu.matmul %6, %8, %cst {dimension_numbers = #tpu.dot_dimension_numbers<[1], [0], [0], [1], [0, 0, 1, 1], [], []>} : vector<72x4xbf16>, vector<4x128xbf16>, vector<72x128xf32> -> vector<72x128xf32>
    %10 = arith.addf %4, %9 : vector<72x128xf32>
    %c0_11 = arith.constant 0 : index
    %c0_12 = arith.constant 0 : index
    %11 = vector.load %arg7[%c0_11, %c0_12] : memref<72x128xf32, #tpu.memory_space<vmem>>, vector<72x128xf32>
    tpu.vector_store %arg7[%c0_11, %c0_12], %10 {strides = array<i32>} : memref<72x128xf32, #tpu.memory_space<vmem>>, vector<72x128xf32>,
    %c0_13 = arith.constant 0 : index
    %c0_14 = arith.constant 0 : index
    %12 = vector.load %arg7[%c0_13, %c0_14] : memref<72x128xf32, #tpu.memory_space<vmem>>, vector<72x128xf32>
    %c1 = arith.constant 1 : index
    %c0_15 = arith.constant 0 : index
    %c0_16 = arith.constant 0 : index
    %13 = vector.load %arg1[%c1, %c0_15, %c0_16] : memref<4x90x4xbf16, #tpu.memory_space<vmem>>, vector<1x72x4xbf16>
    %14 = vector.shape_cast %13 : vector<1x72x4xbf16> to vector<72x4xbf16>
    %c1_17 = arith.constant 1 : index
    %c0_18 = arith.constant 0 : index
    %c0_19 = arith.constant 0 : index
    %15 = vector.load %arg2[%c1_17, %c0_18, %c0_19] : memref<9x4x128xbf16, #tpu.memory_space<vmem>>, vector<1x4x128xbf16>
    %16 = vector.shape_cast %15 : vector<1x4x128xbf16> to vector<4x128xbf16>
    %cst_20 = arith.constant dense<0.000000e+00> : vector<72x128xf32>
    %17 = tpu.matmul %14, %16, %cst_20 {dimension_numbers = #tpu.dot_dimension_numbers<[1], [0], [0], [1], [0, 0, 1, 1], [], []>} : vector<72x4xbf16>, vector<4x128xbf16>, vector<72x128xf32> -> vector<72x128xf32>
    %18 = arith.addf %12, %17 : vector<72x128xf32>
    %c0_21 = arith.constant 0 : index
    %c0_22 = arith.constant 0 : index
    %19 = vector.load %arg7[%c0_21, %c0_22] : memref<72x128xf32, #tpu.memory_space<vmem>>, vector<72x128xf32>
    tpu.vector_store %arg7[%c0_21, %c0_22], %18 {strides = array<i32>} : memref<72x128xf32, #tpu.memory_space<vmem>>, vector<72x128xf32>,
    %c0_23 = arith.constant 0 : index
    %c0_24 = arith.constant 0 : index
    %20 = vector.load %arg7[%c0_23, %c0_24] : memref<72x128xf32, #tpu.memory_space<vmem>>, vector<72x128xf32>
    %c0_25 = arith.constant 0 : index
    %c1_26 = arith.constant 1 : index
    %c0_27 = arith.constant 0 : index
    %21 = vector.load %arg1[%c0_25, %c1_26, %c0_27] : memref<4x90x4xbf16, #tpu.memory_space<vmem>>, vector<1x72x4xbf16>
    %22 = vector.shape_cast %21 : vector<1x72x4xbf16> to vector<72x4xbf16>
    %c2 = arith.constant 2 : index
    %c0_28 = arith.constant 0 : index
    %c0_29 = arith.constant 0 : index
    %23 = vector.load %arg2[%c2, %c0_28, %c0_29] : memref<9x4x128xbf16, #tpu.memory_space<vmem>>, vector<1x4x128xbf16>
    %24 = vector.shape_cast %23 : vector<1x4x128xbf16> to vector<4x128xbf16>
    %cst_30 = arith.constant dense<0.000000e+00> : vector<72x128xf32>
    %25 = tpu.matmul %22, %24, %cst_30 {dimension_numbers = #tpu.dot_dimension_numbers<[1], [0], [0], [1], [0, 0, 1, 1], [], []>} : vector<72x4xbf16>, vector<4x128xbf16>, vector<72x128xf32> -> vector<72x128xf32>
    %26 = arith.addf %20, %25 : vector<72x128xf32>
    %c0_31 = arith.constant 0 : index
    %c0_32 = arith.constant 0 : index
    %27 = vector.load %arg7[%c0_31, %c0_32] : memref<72x128xf32, #tpu.memory_space<vmem>>, vector<72x128xf32>
    tpu.vector_store %arg7[%c0_31, %c0_32], %26 {strides = array<i32>} : memref<72x128xf32, #tpu.memory_space<vmem>>, vector<72x128xf32>,
    %c0_33 = arith.constant 0 : index
    %c0_34 = arith.constant 0 : index
    %28 = vector.load %arg7[%c0_33, %c0_34] : memref<72x128xf32, #tpu.memory_space<vmem>>, vector<72x128xf32>
    %c2_35 = arith.constant 2 : index
    %c0_36 = arith.constant 0 : index
    %c0_37 = arith.constant 0 : index
    %29 = vector.load %arg1[%c2_35, %c0_36, %c0_37] : memref<4x90x4xbf16, #tpu.memory_space<vmem>>, vector<1x72x4xbf16>
    %30 = vector.shape_cast %29 : vector<1x72x4xbf16> to vector<72x4xbf16>
    %c3 = arith.constant 3 : index
    %c0_38 = arith.constant 0 : index
    %c0_39 = arith.constant 0 : index
    %31 = vector.load %arg2[%c3, %c0_38, %c0_39] : memref<9x4x128xbf16, #tpu.memory_space<vmem>>, vector<1x4x128xbf16>
    %32 = vector.shape_cast %31 : vector<1x4x128xbf16> to vector<4x128xbf16>
    %cst_40 = arith.constant dense<0.000000e+00> : vector<72x128xf32>
    %33 = tpu.matmul %30, %32, %cst_40 {dimension_numbers = #tpu.dot_dimension_numbers<[1], [0], [0], [1], [0, 0, 1, 1], [], []>} : vector<72x4xbf16>, vector<4x128xbf16>, vector<72x128xf32> -> vector<72x128xf32>
    %34 = arith.addf %28, %33 : vector<72x128xf32>
    %c0_41 = arith.constant 0 : index
    %c0_42 = arith.constant 0 : index
    %35 = vector.load %arg7[%c0_41, %c0_42] : memref<72x128xf32, #tpu.memory_space<vmem>>, vector<72x128xf32>
    tpu.vector_store %arg7[%c0_41, %c0_42], %34 {strides = array<i32>} : memref<72x128xf32, #tpu.memory_space<vmem>>, vector<72x128xf32>,
    %c0_43 = arith.constant 0 : index
    %c0_44 = arith.constant 0 : index
    %36 = vector.load %arg7[%c0_43, %c0_44] : memref<72x128xf32, #tpu.memory_space<vmem>>, vector<72x128xf32>
    %c3_45 = arith.constant 3 : index
    %c0_46 = arith.constant 0 : index
    %c0_47 = arith.constant 0 : index
    %37 = vector.load %arg1[%c3_45, %c0_46, %c0_47] : memref<4x90x4xbf16, #tpu.memory_space<vmem>>, vector<1x72x4xbf16>
    %38 = vector.shape_cast %37 : vector<1x72x4xbf16> to vector<72x4xbf16>
    %c4 = arith.constant 4 : index
    %c0_48 = arith.constant 0 : index
    %c0_49 = arith.constant 0 : index
    %39 = vector.load %arg2[%c4, %c0_48, %c0_49] : memref<9x4x128xbf16, #tpu.memory_space<vmem>>, vector<1x4x128xbf16>
    %40 = vector.shape_cast %39 : vector<1x4x128xbf16> to vector<4x128xbf16>
    %cst_50 = arith.constant dense<0.000000e+00> : vector<72x128xf32>
    %41 = tpu.matmul %38, %40, %cst_50 {dimension_numbers = #tpu.dot_dimension_numbers<[1], [0], [0], [1], [0, 0, 1, 1], [], []>} : vector<72x4xbf16>, vector<4x128xbf16>, vector<72x128xf32> -> vector<72x128xf32>
    %42 = arith.addf %36, %41 : vector<72x128xf32>
    %c0_51 = arith.constant 0 : index
    %c0_52 = arith.constant 0 : index
    %43 = vector.load %arg7[%c0_51, %c0_52] : memref<72x128xf32, #tpu.memory_space<vmem>>, vector<72x128xf32>
    tpu.vector_store %arg7[%c0_51, %c0_52], %42 {strides = array<i32>} : memref<72x128xf32, #tpu.memory_space<vmem>>, vector<72x128xf32>,
    %c0_53 = arith.constant 0 : index
    %c0_54 = arith.constant 0 : index
    %44 = vector.load %arg7[%c0_53, %c0_54] : memref<72x128xf32, #tpu.memory_space<vmem>>, vector<72x128xf32>
    %c2_55 = arith.constant 2 : index
    %c1_56 = arith.constant 1 : index
    %c0_57 = arith.constant 0 : index
    %45 = vector.load %arg1[%c2_55, %c1_56, %c0_57] : memref<4x90x4xbf16, #tpu.memory_space<vmem>>, vector<1x72x4xbf16>
    %46 = vector.shape_cast %45 : vector<1x72x4xbf16> to vector<72x4xbf16>
    %c5 = arith.constant 5 : index
    %c0_58 = arith.constant 0 : index
    %c0_59 = arith.constant 0 : index
    %47 = vector.load %arg2[%c5, %c0_58, %c0_59] : memref<9x4x128xbf16, #tpu.memory_space<vmem>>, vector<1x4x128xbf16>
    %48 = vector.shape_cast %47 : vector<1x4x128xbf16> to vector<4x128xbf16>
    %cst_60 = arith.constant dense<0.000000e+00> : vector<72x128xf32>
    %49 = tpu.matmul %46, %48, %cst_60 {dimension_numbers = #tpu.dot_dimension_numbers<[1], [0], [0], [1], [0, 0, 1, 1], [], []>} : vector<72x4xbf16>, vector<4x128xbf16>, vector<72x128xf32> -> vector<72x128xf32>
    %50 = arith.addf %44, %49 : vector<72x128xf32>
    %c0_61 = arith.constant 0 : index
    %c0_62 = arith.constant 0 : index
    %51 = vector.load %arg7[%c0_61, %c0_62] : memref<72x128xf32, #tpu.memory_space<vmem>>, vector<72x128xf32>
    tpu.vector_store %arg7[%c0_61, %c0_62], %50 {strides = array<i32>} : memref<72x128xf32, #tpu.memory_space<vmem>>, vector<72x128xf32>,
    %c0_63 = arith.constant 0 : index
    %c0_64 = arith.constant 0 : index
    %52 = vector.load %arg7[%c0_63, %c0_64] : memref<72x128xf32, #tpu.memory_space<vmem>>, vector<72x128xf32>
    %c0_65 = arith.constant 0 : index
    %c9 = arith.constant 9 : index
    %c0_66 = arith.constant 0 : index
    %53 = vector.load %arg1[%c0_65, %c9, %c0_66] : memref<4x90x4xbf16, #tpu.memory_space<vmem>>, vector<1x72x4xbf16>
    %54 = vector.shape_cast %53 : vector<1x72x4xbf16> to vector<72x4xbf16>
    %c6 = arith.constant 6 : index
    %c0_67 = arith.constant 0 : index
    %c0_68 = arith.constant 0 : index
    %55 = vector.load %arg2[%c6, %c0_67, %c0_68] : memref<9x4x128xbf16, #tpu.memory_space<vmem>>, vector<1x4x128xbf16>
    %56 = vector.shape_cast %55 : vector<1x4x128xbf16> to vector<4x128xbf16>
    %cst_69 = arith.constant dense<0.000000e+00> : vector<72x128xf32>
    %57 = tpu.matmul %54, %56, %cst_69 {dimension_numbers = #tpu.dot_dimension_numbers<[1], [0], [0], [1], [0, 0, 1, 1], [], []>} : vector<72x4xbf16>, vector<4x128xbf16>, vector<72x128xf32> -> vector<72x128xf32>
    %58 = arith.addf %52, %57 : vector<72x128xf32>
    %c0_70 = arith.constant 0 : index
    %c0_71 = arith.constant 0 : index
    %59 = vector.load %arg7[%c0_70, %c0_71] : memref<72x128xf32, #tpu.memory_space<vmem>>, vector<72x128xf32>
    tpu.vector_store %arg7[%c0_70, %c0_71], %58 {strides = array<i32>} : memref<72x128xf32, #tpu.memory_space<vmem>>, vector<72x128xf32>,
    %c0_72 = arith.constant 0 : index
    %c0_73 = arith.constant 0 : index
    %60 = vector.load %arg7[%c0_72, %c0_73] : memref<72x128xf32, #tpu.memory_space<vmem>>, vector<72x128xf32>
    %c1_74 = arith.constant 1 : index
    %c9_75 = arith.constant 9 : index
    %c0_76 = arith.constant 0 : index
    %61 = vector.load %arg1[%c1_74, %c9_75, %c0_76] : memref<4x90x4xbf16, #tpu.memory_space<vmem>>, vector<1x72x4xbf16>
    %62 = vector.shape_cast %61 : vector<1x72x4xbf16> to vector<72x4xbf16>
    %c7 = arith.constant 7 : index
    %c0_77 = arith.constant 0 : index
    %c0_78 = arith.constant 0 : index
    %63 = vector.load %arg2[%c7, %c0_77, %c0_78] : memref<9x4x128xbf16, #tpu.memory_space<vmem>>, vector<1x4x128xbf16>
    %64 = vector.shape_cast %63 : vector<1x4x128xbf16> to vector<4x128xbf16>
    %cst_79 = arith.constant dense<0.000000e+00> : vector<72x128xf32>
    %65 = tpu.matmul %62, %64, %cst_79 {dimension_numbers = #tpu.dot_dimension_numbers<[1], [0], [0], [1], [0, 0, 1, 1], [], []>} : vector<72x4xbf16>, vector<4x128xbf16>, vector<72x128xf32> -> vector<72x128xf32>
    %66 = arith.addf %60, %65 : vector<72x128xf32>
    %c0_80 = arith.constant 0 : index
    %c0_81 = arith.constant 0 : index
    %67 = vector.load %arg7[%c0_80, %c0_81] : memref<72x128xf32, #tpu.memory_space<vmem>>, vector<72x128xf32>
    tpu.vector_store %arg7[%c0_80, %c0_81], %66 {strides = array<i32>} : memref<72x128xf32, #tpu.memory_space<vmem>>, vector<72x128xf32>,
    %c0_82 = arith.constant 0 : index
    %c0_83 = arith.constant 0 : index
    %68 = vector.load %arg7[%c0_82, %c0_83] : memref<72x128xf32, #tpu.memory_space<vmem>>, vector<72x128xf32>
    %c0_84 = arith.constant 0 : index
    %c10 = arith.constant 10 : index
    %c0_85 = arith.constant 0 : index
    %69 = vector.load %arg1[%c0_84, %c10, %c0_85] : memref<4x90x4xbf16, #tpu.memory_space<vmem>>, vector<1x72x4xbf16>
    %70 = vector.shape_cast %69 : vector<1x72x4xbf16> to vector<72x4xbf16>
    %c8 = arith.constant 8 : index
    %c0_86 = arith.constant 0 : index
    %c0_87 = arith.constant 0 : index
    %71 = vector.load %arg2[%c8, %c0_86, %c0_87] : memref<9x4x128xbf16, #tpu.memory_space<vmem>>, vector<1x4x128xbf16>
    %72 = vector.shape_cast %71 : vector<1x4x128xbf16> to vector<4x128xbf16>
    %cst_88 = arith.constant dense<0.000000e+00> : vector<72x128xf32>
    %73 = tpu.matmul %70, %72, %cst_88 {dimension_numbers = #tpu.dot_dimension_numbers<[1], [0], [0], [1], [0, 0, 1, 1], [], []>} : vector<72x4xbf16>, vector<4x128xbf16>, vector<72x128xf32> -> vector<72x128xf32>
    %74 = arith.addf %68, %73 : vector<72x128xf32>
    %c0_89 = arith.constant 0 : index
    %c0_90 = arith.constant 0 : index
    %75 = vector.load %arg7[%c0_89, %c0_90] : memref<72x128xf32, #tpu.memory_space<vmem>>, vector<72x128xf32>
    tpu.vector_store %arg7[%c0_89, %c0_90], %74 {strides = array<i32>} : memref<72x128xf32, #tpu.memory_space<vmem>>, vector<72x128xf32>,
    %cst_91 = arith.constant 0.000000e+00 : bf16
    %76 = vector.broadcast %cst_91 : bf16 to vector<104x128xbf16>
    %c0_92 = arith.constant 0 : index
    %c0_93 = arith.constant 0 : index
    %77 = vector.load %arg8[%c0_92, %c0_93] : memref<104x128xbf16, #tpu.memory_space<vmem>>, vector<104x128xbf16>
    tpu.vector_store %arg8[%c0_92, %c0_93], %76 {strides = array<i32>} : memref<104x128xbf16, #tpu.memory_space<vmem>>, vector<104x128xbf16>,
    %c0_94 = arith.constant 0 : index
    %c0_95 = arith.constant 0 : index
    %78 = vector.load %arg7[%c0_94, %c0_95] : memref<72x128xf32, #tpu.memory_space<vmem>>, vector<8x128xf32>
    %cst_96 = arith.constant 0.000000e+00 : f32
    %79 = vector.broadcast %cst_96 : f32 to vector<8x128xf32>
    %80 = arith.maximumf %78, %79 : vector<8x128xf32>
    %81 = arith.truncf %80 : vector<8x128xf32> to vector<8x128xbf16>
    %c11 = arith.constant 11 : index
    %c0_97 = arith.constant 0 : index
    %82 = vector.load %arg8[%c11, %c0_97] : memref<104x128xbf16, #tpu.memory_space<vmem>>, vector<8x128xbf16>
    tpu.vector_store %arg8[%c11, %c0_97], %81 {strides = array<i32>} : memref<104x128xbf16, #tpu.memory_space<vmem>>, vector<8x128xbf16>,
    %c9_98 = arith.constant 9 : index
    %c0_99 = arith.constant 0 : index
    %83 = vector.load %arg7[%c9_98, %c0_99] : memref<72x128xf32, #tpu.memory_space<vmem>>, vector<8x128xf32>
    %cst_100 = arith.constant 0.000000e+00 : f32
    %84 = vector.broadcast %cst_100 : f32 to vector<8x128xf32>
    %85 = arith.maximumf %83, %84 : vector<8x128xf32>
    %86 = arith.truncf %85 : vector<8x128xf32> to vector<8x128xbf16>
    %c21 = arith.constant 21 : index
    %c0_101 = arith.constant 0 : index
    %87 = vector.load %arg8[%c21, %c0_101] : memref<104x128xbf16, #tpu.memory_space<vmem>>, vector<8x128xbf16>
    tpu.vector_store %arg8[%c21, %c0_101], %86 {strides = array<i32>} : memref<104x128xbf16, #tpu.memory_space<vmem>>, vector<8x128xbf16>,
    %c18 = arith.constant 18 : index
    %c0_102 = arith.constant 0 : index
    %88 = vector.load %arg7[%c18, %c0_102] : memref<72x128xf32, #tpu.memory_space<vmem>>, vector<8x128xf32>
    %cst_103 = arith.constant 0.000000e+00 : f32
    %89 = vector.broadcast %cst_103 : f32 to vector<8x128xf32>
    %90 = arith.maximumf %88, %89 : vector<8x128xf32>
    %91 = arith.truncf %90 : vector<8x128xf32> to vector<8x128xbf16>
    %c31 = arith.constant 31 : index
    %c0_104 = arith.constant 0 : index
    %92 = vector.load %arg8[%c31, %c0_104] : memref<104x128xbf16, #tpu.memory_space<vmem>>, vector<8x128xbf16>
    tpu.vector_store %arg8[%c31, %c0_104], %91 {strides = array<i32>} : memref<104x128xbf16, #tpu.memory_space<vmem>>, vector<8x128xbf16>,
    %c27 = arith.constant 27 : index
    %c0_105 = arith.constant 0 : index
    %93 = vector.load %arg7[%c27, %c0_105] : memref<72x128xf32, #tpu.memory_space<vmem>>, vector<8x128xf32>
    %cst_106 = arith.constant 0.000000e+00 : f32
    %94 = vector.broadcast %cst_106 : f32 to vector<8x128xf32>
    %95 = arith.maximumf %93, %94 : vector<8x128xf32>
    %96 = arith.truncf %95 : vector<8x128xf32> to vector<8x128xbf16>
    %c41 = arith.constant 41 : index
    %c0_107 = arith.constant 0 : index
    %97 = vector.load %arg8[%c41, %c0_107] : memref<104x128xbf16, #tpu.memory_space<vmem>>, vector<8x128xbf16>
    tpu.vector_store %arg8[%c41, %c0_107], %96 {strides = array<i32>} : memref<104x128xbf16, #tpu.memory_space<vmem>>, vector<8x128xbf16>,
    %c36 = arith.constant 36 : index
    %c0_108 = arith.constant 0 : index
    %98 = vector.load %arg7[%c36, %c0_108] : memref<72x128xf32, #tpu.memory_space<vmem>>, vector<8x128xf32>
    %cst_109 = arith.constant 0.000000e+00 : f32
    %99 = vector.broadcast %cst_109 : f32 to vector<8x128xf32>
    %100 = arith.maximumf %98, %99 : vector<8x128xf32>
    %101 = arith.truncf %100 : vector<8x128xf32> to vector<8x128xbf16>
    %c51 = arith.constant 51 : index
    %c0_110 = arith.constant 0 : index
    %102 = vector.load %arg8[%c51, %c0_110] : memref<104x128xbf16, #tpu.memory_space<vmem>>, vector<8x128xbf16>
    tpu.vector_store %arg8[%c51, %c0_110], %101 {strides = array<i32>} : memref<104x128xbf16, #tpu.memory_space<vmem>>, vector<8x128xbf16>,
    %c45 = arith.constant 45 : index
    %c0_111 = arith.constant 0 : index
    %103 = vector.load %arg7[%c45, %c0_111] : memref<72x128xf32, #tpu.memory_space<vmem>>, vector<8x128xf32>
    %cst_112 = arith.constant 0.000000e+00 : f32
    %104 = vector.broadcast %cst_112 : f32 to vector<8x128xf32>
    %105 = arith.maximumf %103, %104 : vector<8x128xf32>
    %106 = arith.truncf %105 : vector<8x128xf32> to vector<8x128xbf16>
    %c61 = arith.constant 61 : index
    %c0_113 = arith.constant 0 : index
    %107 = vector.load %arg8[%c61, %c0_113] : memref<104x128xbf16, #tpu.memory_space<vmem>>, vector<8x128xbf16>
    tpu.vector_store %arg8[%c61, %c0_113], %106 {strides = array<i32>} : memref<104x128xbf16, #tpu.memory_space<vmem>>, vector<8x128xbf16>,
    %c54 = arith.constant 54 : index
    %c0_114 = arith.constant 0 : index
    %108 = vector.load %arg7[%c54, %c0_114] : memref<72x128xf32, #tpu.memory_space<vmem>>, vector<8x128xf32>
    %cst_115 = arith.constant 0.000000e+00 : f32
    %109 = vector.broadcast %cst_115 : f32 to vector<8x128xf32>
    %110 = arith.maximumf %108, %109 : vector<8x128xf32>
    %111 = arith.truncf %110 : vector<8x128xf32> to vector<8x128xbf16>
    %c71 = arith.constant 71 : index
    %c0_116 = arith.constant 0 : index
    %112 = vector.load %arg8[%c71, %c0_116] : memref<104x128xbf16, #tpu.memory_space<vmem>>, vector<8x128xbf16>
    tpu.vector_store %arg8[%c71, %c0_116], %111 {strides = array<i32>} : memref<104x128xbf16, #tpu.memory_space<vmem>>, vector<8x128xbf16>,
    %c63 = arith.constant 63 : index
    %c0_117 = arith.constant 0 : index
    %113 = vector.load %arg7[%c63, %c0_117] : memref<72x128xf32, #tpu.memory_space<vmem>>, vector<8x128xf32>
    %cst_118 = arith.constant 0.000000e+00 : f32
    %114 = vector.broadcast %cst_118 : f32 to vector<8x128xf32>
    %115 = arith.maximumf %113, %114 : vector<8x128xf32>
    %116 = arith.truncf %115 : vector<8x128xf32> to vector<8x128xbf16>
    %c81 = arith.constant 81 : index
    %c0_119 = arith.constant 0 : index
    %117 = vector.load %arg8[%c81, %c0_119] : memref<104x128xbf16, #tpu.memory_space<vmem>>, vector<8x128xbf16>
    tpu.vector_store %arg8[%c81, %c0_119], %116 {strides = array<i32>} : memref<104x128xbf16, #tpu.memory_space<vmem>>, vector<8x128xbf16>,
    %c0_120 = arith.constant 0 : index
    %c0_121 = arith.constant 0 : index
    %118 = vector.load %arg5[%c0_120, %c0_121] : memref<1x128xf32, #tpu.memory_space<vmem>>, vector<1x128xf32>
    %119 = vector.shape_cast %118 : vector<1x128xf32> to vector<1x128xf32>
    %120 = vector.broadcast %119 : vector<1x128xf32> to vector<80x128xf32>
    %c0_122 = arith.constant 0 : index
    %c0_123 = arith.constant 0 : index
    %121 = vector.load %arg9[%c0_122, %c0_123] : memref<80x128xf32, #tpu.memory_space<vmem>>, vector<80x128xf32>
    tpu.vector_store %arg9[%c0_122, %c0_123], %120 {strides = array<i32>} : memref<80x128xf32, #tpu.memory_space<vmem>>, vector<80x128xf32>,
    %c0_124 = arith.constant 0 : index
    %c0_125 = arith.constant 0 : index
    %122 = vector.load %arg9[%c0_124, %c0_125] : memref<80x128xf32, #tpu.memory_space<vmem>>, vector<80x128xf32>
    %c0_126 = arith.constant 0 : index
    %c0_127 = arith.constant 0 : index
    %123 = vector.load %arg8[%c0_126, %c0_127] : memref<104x128xbf16, #tpu.memory_space<vmem>>, vector<80x128xbf16>
    %c0_128 = arith.constant 0 : index
    %c0_129 = arith.constant 0 : index
    %c0_130 = arith.constant 0 : index
    %124 = vector.load %arg4[%c0_128, %c0_129, %c0_130] : memref<9x128x128xbf16, #tpu.memory_space<vmem>>, vector<1x128x128xbf16>
    %125 = vector.shape_cast %124 : vector<1x128x128xbf16> to vector<128x128xbf16>
    %cst_131 = arith.constant dense<0.000000e+00> : vector<80x128xf32>
    %126 = tpu.matmul %123, %125, %cst_131 {dimension_numbers = #tpu.dot_dimension_numbers<[1], [0], [0], [1], [0, 0, 1, 1], [], []>} : vector<80x128xbf16>, vector<128x128xbf16>, vector<80x128xf32> -> vector<80x128xf32>
    %127 = arith.addf %122, %126 : vector<80x128xf32>
    %c0_132 = arith.constant 0 : index
    %c0_133 = arith.constant 0 : index
    %128 = vector.load %arg9[%c0_132, %c0_133] : memref<80x128xf32, #tpu.memory_space<vmem>>, vector<80x128xf32>
    tpu.vector_store %arg9[%c0_132, %c0_133], %127 {strides = array<i32>} : memref<80x128xf32, #tpu.memory_space<vmem>>, vector<80x128xf32>,
    %c0_134 = arith.constant 0 : index
    %c0_135 = arith.constant 0 : index
    %129 = vector.load %arg9[%c0_134, %c0_135] : memref<80x128xf32, #tpu.memory_space<vmem>>, vector<80x128xf32>
    %c1_136 = arith.constant 1 : index
    %c0_137 = arith.constant 0 : index
    %130 = vector.load %arg8[%c1_136, %c0_137] : memref<104x128xbf16, #tpu.memory_space<vmem>>, vector<80x128xbf16>
    %c1_138 = arith.constant 1 : index
    %c0_139 = arith.constant 0 : index
    %c0_140 = arith.constant 0 : index
    %131 = vector.load %arg4[%c1_138, %c0_139, %c0_140] : memref<9x128x128xbf16, #tpu.memory_space<vmem>>, vector<1x128x128xbf16>
    %132 = vector.shape_cast %131 : vector<1x128x128xbf16> to vector<128x128xbf16>
    %cst_141 = arith.constant dense<0.000000e+00> : vector<80x128xf32>
    %133 = tpu.matmul %130, %132, %cst_141 {dimension_numbers = #tpu.dot_dimension_numbers<[1], [0], [0], [1], [0, 0, 1, 1], [], []>} : vector<80x128xbf16>, vector<128x128xbf16>, vector<80x128xf32> -> vector<80x128xf32>
    %134 = arith.addf %129, %133 : vector<80x128xf32>
    %c0_142 = arith.constant 0 : index
    %c0_143 = arith.constant 0 : index
    %135 = vector.load %arg9[%c0_142, %c0_143] : memref<80x128xf32, #tpu.memory_space<vmem>>, vector<80x128xf32>
    tpu.vector_store %arg9[%c0_142, %c0_143], %134 {strides = array<i32>} : memref<80x128xf32, #tpu.memory_space<vmem>>, vector<80x128xf32>,
    %c0_144 = arith.constant 0 : index
    %c0_145 = arith.constant 0 : index
    %136 = vector.load %arg9[%c0_144, %c0_145] : memref<80x128xf32, #tpu.memory_space<vmem>>, vector<80x128xf32>
    %c2_146 = arith.constant 2 : index
    %c0_147 = arith.constant 0 : index
    %137 = vector.load %arg8[%c2_146, %c0_147] : memref<104x128xbf16, #tpu.memory_space<vmem>>, vector<80x128xbf16>
    %c2_148 = arith.constant 2 : index
    %c0_149 = arith.constant 0 : index
    %c0_150 = arith.constant 0 : index
    %138 = vector.load %arg4[%c2_148, %c0_149, %c0_150] : memref<9x128x128xbf16, #tpu.memory_space<vmem>>, vector<1x128x128xbf16>
    %139 = vector.shape_cast %138 : vector<1x128x128xbf16> to vector<128x128xbf16>
    %cst_151 = arith.constant dense<0.000000e+00> : vector<80x128xf32>
    %140 = tpu.matmul %137, %139, %cst_151 {dimension_numbers = #tpu.dot_dimension_numbers<[1], [0], [0], [1], [0, 0, 1, 1], [], []>} : vector<80x128xbf16>, vector<128x128xbf16>, vector<80x128xf32> -> vector<80x128xf32>
    %141 = arith.addf %136, %140 : vector<80x128xf32>
    %c0_152 = arith.constant 0 : index
    %c0_153 = arith.constant 0 : index
    %142 = vector.load %arg9[%c0_152, %c0_153] : memref<80x128xf32, #tpu.memory_space<vmem>>, vector<80x128xf32>
    tpu.vector_store %arg9[%c0_152, %c0_153], %141 {strides = array<i32>} : memref<80x128xf32, #tpu.memory_space<vmem>>, vector<80x128xf32>,
    %c0_154 = arith.constant 0 : index
    %c0_155 = arith.constant 0 : index
    %143 = vector.load %arg9[%c0_154, %c0_155] : memref<80x128xf32, #tpu.memory_space<vmem>>, vector<80x128xf32>
    %c10_156 = arith.constant 10 : index
    %c0_157 = arith.constant 0 : index
    %144 = vector.load %arg8[%c10_156, %c0_157] : memref<104x128xbf16, #tpu.memory_space<vmem>>, vector<80x128xbf16>
    %c3_158 = arith.constant 3 : index
    %c0_159 = arith.constant 0 : index
    %c0_160 = arith.constant 0 : index
    %145 = vector.load %arg4[%c3_158, %c0_159, %c0_160] : memref<9x128x128xbf16, #tpu.memory_space<vmem>>, vector<1x128x128xbf16>
    %146 = vector.shape_cast %145 : vector<1x128x128xbf16> to vector<128x128xbf16>
    %cst_161 = arith.constant dense<0.000000e+00> : vector<80x128xf32>
    %147 = tpu.matmul %144, %146, %cst_161 {dimension_numbers = #tpu.dot_dimension_numbers<[1], [0], [0], [1], [0, 0, 1, 1], [], []>} : vector<80x128xbf16>, vector<128x128xbf16>, vector<80x128xf32> -> vector<80x128xf32>
    %148 = arith.addf %143, %147 : vector<80x128xf32>
    %c0_162 = arith.constant 0 : index
    %c0_163 = arith.constant 0 : index
    %149 = vector.load %arg9[%c0_162, %c0_163] : memref<80x128xf32, #tpu.memory_space<vmem>>, vector<80x128xf32>
    tpu.vector_store %arg9[%c0_162, %c0_163], %148 {strides = array<i32>} : memref<80x128xf32, #tpu.memory_space<vmem>>, vector<80x128xf32>,
    %c0_164 = arith.constant 0 : index
    %c0_165 = arith.constant 0 : index
    %150 = vector.load %arg9[%c0_164, %c0_165] : memref<80x128xf32, #tpu.memory_space<vmem>>, vector<80x128xf32>
    %c11_166 = arith.constant 11 : index
    %c0_167 = arith.constant 0 : index
    %151 = vector.load %arg8[%c11_166, %c0_167] : memref<104x128xbf16, #tpu.memory_space<vmem>>, vector<80x128xbf16>
    %c4_168 = arith.constant 4 : index
    %c0_169 = arith.constant 0 : index
    %c0_170 = arith.constant 0 : index
    %152 = vector.load %arg4[%c4_168, %c0_169, %c0_170] : memref<9x128x128xbf16, #tpu.memory_space<vmem>>, vector<1x128x128xbf16>
    %153 = vector.shape_cast %152 : vector<1x128x128xbf16> to vector<128x128xbf16>
    %cst_171 = arith.constant dense<0.000000e+00> : vector<80x128xf32>
    %154 = tpu.matmul %151, %153, %cst_171 {dimension_numbers = #tpu.dot_dimension_numbers<[1], [0], [0], [1], [0, 0, 1, 1], [], []>} : vector<80x128xbf16>, vector<128x128xbf16>, vector<80x128xf32> -> vector<80x128xf32>
    %155 = arith.addf %150, %154 : vector<80x128xf32>
    %c0_172 = arith.constant 0 : index
    %c0_173 = arith.constant 0 : index
    %156 = vector.load %arg9[%c0_172, %c0_173] : memref<80x128xf32, #tpu.memory_space<vmem>>, vector<80x128xf32>
    tpu.vector_store %arg9[%c0_172, %c0_173], %155 {strides = array<i32>} : memref<80x128xf32, #tpu.memory_space<vmem>>, vector<80x128xf32>,
    %c0_174 = arith.constant 0 : index
    %c0_175 = arith.constant 0 : index
    %157 = vector.load %arg9[%c0_174, %c0_175] : memref<80x128xf32, #tpu.memory_space<vmem>>, vector<80x128xf32>
    %c12 = arith.constant 12 : index
    %c0_176 = arith.constant 0 : index
    %158 = vector.load %arg8[%c12, %c0_176] : memref<104x128xbf16, #tpu.memory_space<vmem>>, vector<80x128xbf16>
    %c5_177 = arith.constant 5 : index
    %c0_178 = arith.constant 0 : index
    %c0_179 = arith.constant 0 : index
    %159 = vector.load %arg4[%c5_177, %c0_178, %c0_179] : memref<9x128x128xbf16, #tpu.memory_space<vmem>>, vector<1x128x128xbf16>
    %160 = vector.shape_cast %159 : vector<1x128x128xbf16> to vector<128x128xbf16>
    %cst_180 = arith.constant dense<0.000000e+00> : vector<80x128xf32>
    %161 = tpu.matmul %158, %160, %cst_180 {dimension_numbers = #tpu.dot_dimension_numbers<[1], [0], [0], [1], [0, 0, 1, 1], [], []>} : vector<80x128xbf16>, vector<128x128xbf16>, vector<80x128xf32> -> vector<80x128xf32>
    %162 = arith.addf %157, %161 : vector<80x128xf32>
    %c0_181 = arith.constant 0 : index
    %c0_182 = arith.constant 0 : index
    %163 = vector.load %arg9[%c0_181, %c0_182] : memref<80x128xf32, #tpu.memory_space<vmem>>, vector<80x128xf32>
    tpu.vector_store %arg9[%c0_181, %c0_182], %162 {strides = array<i32>} : memref<80x128xf32, #tpu.memory_space<vmem>>, vector<80x128xf32>,
    %c0_183 = arith.constant 0 : index
    %c0_184 = arith.constant 0 : index
    %164 = vector.load %arg9[%c0_183, %c0_184] : memref<80x128xf32, #tpu.memory_space<vmem>>, vector<80x128xf32>
    %c20 = arith.constant 20 : index
    %c0_185 = arith.constant 0 : index
    %165 = vector.load %arg8[%c20, %c0_185] : memref<104x128xbf16, #tpu.memory_space<vmem>>, vector<80x128xbf16>
    %c6_186 = arith.constant 6 : index
    %c0_187 = arith.constant 0 : index
    %c0_188 = arith.constant 0 : index
    %166 = vector.load %arg4[%c6_186, %c0_187, %c0_188] : memref<9x128x128xbf16, #tpu.memory_space<vmem>>, vector<1x128x128xbf16>
    %167 = vector.shape_cast %166 : vector<1x128x128xbf16> to vector<128x128xbf16>
    %cst_189 = arith.constant dense<0.000000e+00> : vector<80x128xf32>
    %168 = tpu.matmul %165, %167, %cst_189 {dimension_numbers = #tpu.dot_dimension_numbers<[1], [0], [0], [1], [0, 0, 1, 1], [], []>} : vector<80x128xbf16>, vector<128x128xbf16>, vector<80x128xf32> -> vector<80x128xf32>
    %169 = arith.addf %164, %168 : vector<80x128xf32>
    %c0_190 = arith.constant 0 : index
    %c0_191 = arith.constant 0 : index
    %170 = vector.load %arg9[%c0_190, %c0_191] : memref<80x128xf32, #tpu.memory_space<vmem>>, vector<80x128xf32>
    tpu.vector_store %arg9[%c0_190, %c0_191], %169 {strides = array<i32>} : memref<80x128xf32, #tpu.memory_space<vmem>>, vector<80x128xf32>,
    %c0_192 = arith.constant 0 : index
    %c0_193 = arith.constant 0 : index
    %171 = vector.load %arg9[%c0_192, %c0_193] : memref<80x128xf32, #tpu.memory_space<vmem>>, vector<80x128xf32>
    %c21_194 = arith.constant 21 : index
    %c0_195 = arith.constant 0 : index
    %172 = vector.load %arg8[%c21_194, %c0_195] : memref<104x128xbf16, #tpu.memory_space<vmem>>, vector<80x128xbf16>
    %c7_196 = arith.constant 7 : index
    %c0_197 = arith.constant 0 : index
    %c0_198 = arith.constant 0 : index
    %173 = vector.load %arg4[%c7_196, %c0_197, %c0_198] : memref<9x128x128xbf16, #tpu.memory_space<vmem>>, vector<1x128x128xbf16>
    %174 = vector.shape_cast %173 : vector<1x128x128xbf16> to vector<128x128xbf16>
    %cst_199 = arith.constant dense<0.000000e+00> : vector<80x128xf32>
    %175 = tpu.matmul %172, %174, %cst_199 {dimension_numbers = #tpu.dot_dimension_numbers<[1], [0], [0], [1], [0, 0, 1, 1], [], []>} : vector<80x128xbf16>, vector<128x128xbf16>, vector<80x128xf32> -> vector<80x128xf32>
    %176 = arith.addf %171, %175 : vector<80x128xf32>
    %c0_200 = arith.constant 0 : index
    %c0_201 = arith.constant 0 : index
    %177 = vector.load %arg9[%c0_200, %c0_201] : memref<80x128xf32, #tpu.memory_space<vmem>>, vector<80x128xf32>
    tpu.vector_store %arg9[%c0_200, %c0_201], %176 {strides = array<i32>} : memref<80x128xf32, #tpu.memory_space<vmem>>, vector<80x128xf32>,
    %c0_202 = arith.constant 0 : index
    %c0_203 = arith.constant 0 : index
    %178 = vector.load %arg9[%c0_202, %c0_203] : memref<80x128xf32, #tpu.memory_space<vmem>>, vector<80x128xf32>
    %c22 = arith.constant 22 : index
    %c0_204 = arith.constant 0 : index
    %179 = vector.load %arg8[%c22, %c0_204] : memref<104x128xbf16, #tpu.memory_space<vmem>>, vector<80x128xbf16>
    %c8_205 = arith.constant 8 : index
    %c0_206 = arith.constant 0 : index
    %c0_207 = arith.constant 0 : index
    %180 = vector.load %arg4[%c8_205, %c0_206, %c0_207] : memref<9x128x128xbf16, #tpu.memory_space<vmem>>, vector<1x128x128xbf16>
    %181 = vector.shape_cast %180 : vector<1x128x128xbf16> to vector<128x128xbf16>
    %cst_208 = arith.constant dense<0.000000e+00> : vector<80x128xf32>
    %182 = tpu.matmul %179, %181, %cst_208 {dimension_numbers = #tpu.dot_dimension_numbers<[1], [0], [0], [1], [0, 0, 1, 1], [], []>} : vector<80x128xbf16>, vector<128x128xbf16>, vector<80x128xf32> -> vector<80x128xf32>
    %183 = arith.addf %178, %182 : vector<80x128xf32>
    %c0_209 = arith.constant 0 : index
    %c0_210 = arith.constant 0 : index
    %184 = vector.load %arg9[%c0_209, %c0_210] : memref<80x128xf32, #tpu.memory_space<vmem>>, vector<80x128xf32>
    tpu.vector_store %arg9[%c0_209, %c0_210], %183 {strides = array<i32>} : memref<80x128xf32, #tpu.memory_space<vmem>>, vector<80x128xf32>,
    %c0_211 = arith.constant 0 : index
    %c0_212 = arith.constant 0 : index
    %185 = vector.load %arg9[%c0_211, %c0_212] : memref<80x128xf32, #tpu.memory_space<vmem>>, vector<8x128xf32>
    %c0_213 = arith.constant 0 : index
    %c0_214 = arith.constant 0 : index
    %186 = vector.load %arg6[%c0_213, %c0_214] : memref<64x128xf32, #tpu.memory_space<vmem>>, vector<8x128xf32>
    tpu.vector_store %arg6[%c0_213, %c0_214], %185 {strides = array<i32>} : memref<64x128xf32, #tpu.memory_space<vmem>>, vector<8x128xf32>,
    %c10_215 = arith.constant 10 : index
    %c0_216 = arith.constant 0 : index
    %187 = vector.load %arg9[%c10_215, %c0_216] : memref<80x128xf32, #tpu.memory_space<vmem>>, vector<8x128xf32>
    %c8_217 = arith.constant 8 : index
    %c0_218 = arith.constant 0 : index
    %188 = vector.load %arg6[%c8_217, %c0_218] : memref<64x128xf32, #tpu.memory_space<vmem>>, vector<8x128xf32>
    tpu.vector_store %arg6[%c8_217, %c0_218], %187 {strides = array<i32>} : memref<64x128xf32, #tpu.memory_space<vmem>>, vector<8x128xf32>,
    %c20_219 = arith.constant 20 : index
    %c0_220 = arith.constant 0 : index
    %189 = vector.load %arg9[%c20_219, %c0_220] : memref<80x128xf32, #tpu.memory_space<vmem>>, vector<8x128xf32>
    %c16 = arith.constant 16 : index
    %c0_221 = arith.constant 0 : index
    %190 = vector.load %arg6[%c16, %c0_221] : memref<64x128xf32, #tpu.memory_space<vmem>>, vector<8x128xf32>
    tpu.vector_store %arg6[%c16, %c0_221], %189 {strides = array<i32>} : memref<64x128xf32, #tpu.memory_space<vmem>>, vector<8x128xf32>,
    %c30 = arith.constant 30 : index
    %c0_222 = arith.constant 0 : index
    %191 = vector.load %arg9[%c30, %c0_222] : memref<80x128xf32, #tpu.memory_space<vmem>>, vector<8x128xf32>
    %c24 = arith.constant 24 : index
    %c0_223 = arith.constant 0 : index
    %192 = vector.load %arg6[%c24, %c0_223] : memref<64x128xf32, #tpu.memory_space<vmem>>, vector<8x128xf32>
    tpu.vector_store %arg6[%c24, %c0_223], %191 {strides = array<i32>} : memref<64x128xf32, #tpu.memory_space<vmem>>, vector<8x128xf32>,
    %c40 = arith.constant 40 : index
    %c0_224 = arith.constant 0 : index
    %193 = vector.load %arg9[%c40, %c0_224] : memref<80x128xf32, #tpu.memory_space<vmem>>, vector<8x128xf32>
    %c32 = arith.constant 32 : index
    %c0_225 = arith.constant 0 : index
    %194 = vector.load %arg6[%c32, %c0_225] : memref<64x128xf32, #tpu.memory_space<vmem>>, vector<8x128xf32>
    tpu.vector_store %arg6[%c32, %c0_225], %193 {strides = array<i32>} : memref<64x128xf32, #tpu.memory_space<vmem>>, vector<8x128xf32>,
    %c50 = arith.constant 50 : index
    %c0_226 = arith.constant 0 : index
    %195 = vector.load %arg9[%c50, %c0_226] : memref<80x128xf32, #tpu.memory_space<vmem>>, vector<8x128xf32>
    %c40_227 = arith.constant 40 : index
    %c0_228 = arith.constant 0 : index
    %196 = vector.load %arg6[%c40_227, %c0_228] : memref<64x128xf32, #tpu.memory_space<vmem>>, vector<8x128xf32>
    tpu.vector_store %arg6[%c40_227, %c0_228], %195 {strides = array<i32>} : memref<64x128xf32, #tpu.memory_space<vmem>>, vector<8x128xf32>,
    %c60 = arith.constant 60 : index
    %c0_229 = arith.constant 0 : index
    %197 = vector.load %arg9[%c60, %c0_229] : memref<80x128xf32, #tpu.memory_space<vmem>>, vector<8x128xf32>
    %c48 = arith.constant 48 : index
    %c0_230 = arith.constant 0 : index
    %198 = vector.load %arg6[%c48, %c0_230] : memref<64x128xf32, #tpu.memory_space<vmem>>, vector<8x128xf32>
    tpu.vector_store %arg6[%c48, %c0_230], %197 {strides = array<i32>} : memref<64x128xf32, #tpu.memory_space<vmem>>, vector<8x128xf32>,
    %c70 = arith.constant 70 : index
    %c0_231 = arith.constant 0 : index
    %199 = vector.load %arg9[%c70, %c0_231] : memref<80x128xf32, #tpu.memory_space<vmem>>, vector<8x128xf32>
    %c56 = arith.constant 56 : index
    %c0_232 = arith.constant 0 : index
    %200 = vector.load %arg6[%c56, %c0_232] : memref<64x128xf32, #tpu.memory_space<vmem>>, vector<8x128xf32>
    tpu.vector_store %arg6[%c56, %c0_232], %199 {strides = array<i32>} : memref<64x128xf32, #tpu.memory_space<vmem>>, vector<8x128xf32>,
    return
  }
  func.func @transform_0(%arg0: i32) -> (i32, i32, i32) {
    %c0_i32 = arith.constant 0 : i32
    %c0_i32_0 = arith.constant 0 : i32
    %c0_i32_1 = arith.constant 0 : i32
    return %arg0, %c0_i32, %c0_i32_0 : i32, i32, i32
  }
  func.func @transform_1(%arg0: i32) -> (i32, i32, i32) {
    %c0_i32 = arith.constant 0 : i32
    %c0_i32_0 = arith.constant 0 : i32
    %c0_i32_1 = arith.constant 0 : i32
    %c0_i32_2 = arith.constant 0 : i32
    return %c0_i32, %c0_i32_0, %c0_i32_1 : i32, i32, i32
  }
  func.func @transform_2(%arg0: i32) -> (i32, i32) {
    %c0_i32 = arith.constant 0 : i32
    %c0_i32_0 = arith.constant 0 : i32
    %c0_i32_1 = arith.constant 0 : i32
    return %c0_i32, %c0_i32_0 : i32, i32
  }
  func.func @transform_3(%arg0: i32) -> (i32, i32, i32) {
    %c0_i32 = arith.constant 0 : i32
    %c0_i32_0 = arith.constant 0 : i32
    %c0_i32_1 = arith.constant 0 : i32
    %c0_i32_2 = arith.constant 0 : i32
    return %c0_i32, %c0_i32_0, %c0_i32_1 : i32, i32, i32
  }
  func.func @transform_4(%arg0: i32) -> (i32, i32) {
    %c0_i32 = arith.constant 0 : i32
    %c0_i32_0 = arith.constant 0 : i32
    %c0_i32_1 = arith.constant 0 : i32
    return %c0_i32, %c0_i32_0 : i32, i32
  }
  func.func @transform_5(%arg0: i32) -> (i32, i32) {
    %c0_i32 = arith.constant 0 : i32
    %c0_i32_0 = arith.constant 0 : i32
    return %arg0, %c0_i32 : i32, i32
  }
}

</mosaic_0001>

<bundles_post_ra>
// kernel: tpu_custom_call.1
= control target key start
LH: loop header
LB: loop body
LE: loop exit
PB: predicated region body
PF: predicated region fallthrough
CT: control target
= control target key end

     0   :  { %10 = vsyncpa [#allocation6], 0  ;;  %s5224_s0 = inlined_call_operand.vmem [shape: bf16[8,90,4], index: 0, kind: input, shape index: {}]   ;;  %s5225_s1 = inlined_call_operand.vmem [shape: bf16[9,4,128], index: 1, kind: input, shape index: {}]   ;;  %s5226_s2 = inlined_call_operand.vmem [shape: f32[1,128], index: 2, kind: input, shape index: {}]   ;;  %s5227_s3 = inlined_call_operand.hbm [shape: bf16[9,128,128], index: 3, kind: input, shape index: {}]   ;;  %s5228_s4 = inlined_call_operand.vmem [shape: f32[1,128], index: 4, kind: input, shape index: {}]   ;;  %s5229_s5 = inlined_call_operand.hbm [shape: f32[128,128], index: 5, kind: output, shape index: {}]  }
   0x1   :  { %11 = vsyncpa [#allocation7], 0 }
   0x2   :  { %13 = vsyncpa [#allocation7 + $0x1], 0  ;;  %s4628_s18 = smov 0   ;;  %s4630_s19 = smov 0  }
   0x3   :  { %s4632_s20 = smov 0   ;;  %s4634_s21 = smov 0  }
   0x4 LB: > { %s4649_s22 = sadd.s32 4294967295, %s4590_s21   ;;  %s3529_s23 = sadd.s32 4294967294, %s4590_s21   ;;  %s4590_s21 = sphi %s4634_s21, %s5251_s21   ;;  %s4586_s20 = sphi %s4632_s20, %s5250_s20   ;;  %s4582_s19 = sphi %s4630_s19, %s5249_s19   ;;  %s4578_s18 = sphi %s4628_s18, %s5248_s18  }
   0x5   : > { %s4653_s24 = sadd.s32 1, %s4590_s21   ;;  %s136_s25 = sadd.s32 1, %s4586_s20 }
   0x6   : > { %s133_s26 = ssub.s32 %s4590_s21, %s4653_s24  ;;  %p146_p0 = scmp.ne.s32.totalorder %s4586_s20, %s4582_s19 }
   0x7   : > { %p134_p1 = scmp.eq.s32.totalorder %s133_s26, 0  ;;  %p147_p2 = scmp.eq.s32.totalorder %s4649_s22, 1 }
   0x8   : > { %p152_p3 = scmp.ne.s32.totalorder %s4582_s19, %s4578_s18  ;;  %p153_p4 = scmp.eq.s32.totalorder %s3529_s23, 1 }
   0x9   : > { %s4664_s27 = scalar_select %p134_p1, %s4586_s20, %s136_s25  }
   0xa   : > { %p4666_p5 = por %p147_p2, %p146_p0  ;;  %p4670_p6 = por %p153_p4, %p152_p3 }
   0xb   : > { %p3530_p7 = scmp.ge.s32.totalorder %s4590_s21, 1  ;;  %p160_p8 = scmp.lt.s32.totalorder %s4590_s21, 3 }
   0xc   : > { %p4451_p9 = scmp.eq.s32.totalorder %s4649_s22, 0  ;;  %s177_s7 = sshll.u32 %s5227_s3, 4  ;;  %s178_s7 = int_to_ptr.hbm [resolvable:$true] %s177_s7 }
   0xd   : > { %p161_p10 = pnand %p3530_p7, %p160_p8  ;;  %s4592_s8 = smov [#allocation5]  }
   0xe   : > { %s179_s9 = sshll.u32 %s4592_s8, 4  ;;  %s4593_s10 = smov 64   ;;  %s180_s9 = int_to_ptr.vmem [resolvable:$true] %s179_s9 }
   0xf   : > { %p4443_p11 = pneg %p161_p10  ;;  %s4594_s11 = smov 4  }
  0x10   : > { %208 = sbr.rel (%p161_p10) target bundleno = 691 (0x2b3), region = 40 }
  0x11   : > { %p4444_p12 = pnand %p4451_p9, %p4443_p11 }
  0x13   : > { %4446 = dma.hbm_to_vmem [thread:$0]  (!%p4444_p12), %s178_s7, 9216, %s180_s9, [#allocation6], %s4593_s10, %s4593_s10, %s4594_s11  }
  0x15   : > { %4569 = dma.done.wait (%p4451_p9), [#allocation6], 9216  }
  0x16   : > { %4571 = vsyncadd (%p4451_p9), [#allocation6], 4294958080  ;;  %s3536_s12 = sshll.u32 %s4649_s22, 2  ;;  %vm318_vm0 = vcmask 1041408   ;;  %v278_v0 = vld [vmem:[%s5225_s1] sm:$0x3] }
  0x17   : > { %p239_p13 = scmp.lt.s32.totalorder %s3536_s12, 7  ;;  %v3568_v1 = vld [vmem:[%s5225_s1 + $0x2] sm:$0x3]  ;;  %v3590_v2 = vld [vmem:[%s5225_s1 + $0x4] sm:$0x3]  ;;  %v320_v3 = vsel %vm318_vm0, %v278_v0, 0 }
  0x18   : > { %v433_v4 = vsel %vm318_vm0, %v3568_v1, 0  ;;  %v588_v6 = vsel %vm318_vm0, %v3590_v2, 0  ;;  %4434 = vmatpush.bf16.msra.mxu2 %v320_v3  ;;  %329 = vmatpush.bf16.msra.mxu0 %v320_v3  ;;  %vm302_vm1 = vcmask 31744   ;;  %v3625_v9 = vld [vmem:[%s5225_s1 + $0x6] sm:$0x3]  ;;  %vm1375_vm3 = vcmask 1046528  }
  0x19   : > { %s5253_s12 = smov (!%p239_p13, %s3536_s12), 7  ;;  %v3656_v10 = vld [vmem:[%s5225_s1 + $0x8] sm:$0x3]  ;;  %4435 = vmatpush.bf16.msra.mxu3 %v433_v4  ;;  %v701_v11 = vsel %vm318_vm0, %v3625_v9, 0  ;;  %442 = vmatpush.bf16.msra.mxu1 %v433_v4  ;;  %v3714_v14 = vld [vmem:[%s5225_s1 + $0xc] sm:$0x3] }
  0x1a   : > { %s4436_s13 = smul.u32 48, %s5253_s12  ;;  %v814_v12 = vsel %vm318_vm0, %v3656_v10, 0  ;;  %v3750_v15 = vld [vmem:[%s5225_s1 + $0xe] sm:$0x3]  ;;  %v1122_v16 = vsel %vm318_vm0, %v3714_v14, 0  ;;  %vm1481_vm4 = vcmask 1043457  }
  0x1b   : > { %v1276_v17 = vsel %vm318_vm0, %v3750_v15, 0  ;;  %v3688_v27 = vld [vmem:[%s5225_s1 + $0xa] sm:$0x3]  ;;  %v3776_v31 = vld [vmem:[%s5225_s1 + $0x10] sm:$0x3]  ;;  %vm1507_vm9 = vcmask 1043458  }
  0x1c   : > { %s4696_s26 = scalar_lea.vmem %s5224_s0, %s4436_s13  ;;  %597 = vmatpush.bf16.msrb.mxu2 %v588_v6  ;;  %823 = vmatpush.bf16.msrb.mxu0 %v814_v12  ;;  %v968_v28 = vsel %vm318_vm0, %v3688_v27, 0  ;;  %v1401_v32 = vsel %vm318_vm0, %v3776_v31, 0  ;;  %vm532_vm2 = vsmask.f32 7424  ;;  %vm1482_vm5 = vsmask.f32 7942 }
  0x1d   : > { %v4278_v5 = vld [vmem:[%s4696_s26 + $0x18] sm:$0xff]  ;;  %v4275_v7 = vld [vmem:[%s4696_s26] sm:$0xff]  ;;  %v4282_v8 = vld [vmem:[%s4696_s26 + $0x48] sm:$0xff]  ;;  %710 = vmatpush.bf16.msrb.mxu3 %v701_v11  ;;  %977 = vmatpush.bf16.msrb.mxu1 %v968_v28  ;;  %vm1488_vm6 = vsmask.f32 1280  ;;  %vm1513_vm11 = vcmask 1042432  }
  0x1e   : > { %v4279_v13 = vld [vmem:[%s4696_s26 + $0x30] sm:$0xff]  ;;  %3557 = vmatmul.msk.bf16.vlgmr.msra.gmra.mxu2 %vm302_vm1, %v4278_v5  ;;  %3554 = vmatmul.msk.bf16.vlgmr.msra.gmra.mxu0 %vm302_vm1, %v4275_v7  ;;  %v277_v18 = vld [vmem:[%s4696_s26 + $0x20] sm:$0xf]  ;;  %v4276_v23 = vld [vmem:[%s4696_s26 + $0x8] sm:$0xff]  ;;  %vm1508_vm10 = vsmask.f32 7946 }
  0x1f   : > { %3588 = vmatmul.msk.bf16.vlgmr.msra.gmra.mxu3 %vm302_vm1, %v4282_v8  ;;  %3585 = vmatmul.msk.bf16.vlgmr.msra.gmra.mxu1 %vm302_vm1, %v4279_v13  ;;  %v3567_v19 = vld [vmem:[%s4696_s26 + $0x50] sm:$0xf]  ;;  %v296_v20 = vunpack.c.l.b16 %v277_v18  ;;  %v4283_v25 = vld [vmem:[%s4696_s26] sm:$0xff]  ;;  %v4280_v26 = vld [vmem:[%s4696_s26 + $0x38] sm:$0xff]  ;;  %vm1514_vm12 = vsmask.f32 2304 }
  0x20   : > { %1131 = vmatpush.bf16.msra.mxu2 %v1122_v16  ;;  %v411_v21 = vunpack.c.l.b16 %v3567_v19  ;;  %v4284_v29 = vld [vmem:[%s4696_s26 + $0x8] sm:$0xff]  ;;  %v536_v30 = vshll.u32 %v4283_v25, 16  ;;  %1410 = vmatpush.bf16.msra.mxu0 %v1401_v32  ;;  %v534_v33 = vshrl.u32 %v4283_v25, 16  ;;  %v4277_v38 = vld [vmem:[%s4696_s26 + $0x10] sm:$0xff]  ;;  %v4288_v40 = vld [vmem:[%s4696_s26 + $0x60] sm:$0xff]  ;;  %vm1533_vm15 = vcmask 1043459  }
  0x21   : > { %1285 = vmatpush.bf16.msra.mxu3 %v1276_v17  ;;  %v301_v22 = vpack.c.b16 %v296_v20, %v296_v20  ;;  %v541_v35 = vshll.u32 %v4284_v29, 16  ;;  %v4281_v41 = vld [vmem:[%s4696_s26 + $0x40] sm:$0xff]  ;;  %v4285_v43 = vld [vmem:[%s4696_s26 + $0x10] sm:$0xff]  ;;  %v4297_v44 = vld [vmem:[%s4696_s26 + $0x68] sm:$0xff]  ;;  %v545_v46 = vshrl.u32 %v4284_v29, 16  ;;  %s235_s7 = sand.u32 1, %s4582_s19  }
  0x22   : > { %v416_v24 = vpack.c.b16 %v411_v21, %v411_v21  ;;  %v538_v34 = vrot.slane %v536_v30, 1  ;;  %v4296_v42 = vld [vmem:[%s4696_s26 + $0x60] sm:$0xff]  ;;  %v549_v47 = vshll.u32 %v4285_v43, 16  ;;  %v921_v50 = vshll.u32 %v4297_v44, 16  ;;  %v4292_v55 = vld [vmem:[%s4696_s26 + $0x90] sm:$0xff]  ;;  %v4289_v57 = vld [vmem:[%s4696_s26 + $0x68] sm:$0xff] }
  0x23   : > { %v543_v37 = vrot.slane %v541_v35, 1  ;;  %v916_v45 = vshll.u32 %v4296_v42, 16  ;;  %v914_v48 = vshrl.u32 %v4296_v42, 16  ;;  %v4286_v59 = vld [vmem:[%s4696_s26 + $0x18] sm:$0xff]  ;;  %v4298_v60 = vld [vmem:[%s4696_s26 + $0x70] sm:$0xff]  ;;  %v553_v61 = vshrl.u32 %v4285_v43, 16  ;;  %vm4934_vm7 = vmand %vm1481_vm4, %vm1482_vm5 }
  0x24   : > { %v539_v36 = vor.u32 %v538_v34, %v534_v33  ;;  %v551_v52 = vrot.slane %v549_v47, 1  ;;  %v923_v54 = vrot.slane %v921_v50, 1  ;;  %v557_v62 = vshll.u32 %v4286_v59, 16  ;;  %v4293_v5 = vld [vmem:[%s4696_s26 + $0x98] sm:$0xff]  ;;  %v4290_v7 = vld [vmem:[%s4696_s26 + $0x70] sm:$0xff]  ;;  %v4294_v21 = vld [vmem:[%s4696_s26 + $0xa0] sm:$0xff] }
  0x25   : > { %v918_v49 = vrot.slane %v916_v45, 1  ;;  %v547_v51 = vor.u32 %v545_v46, %v543_v37  ;;  %v925_v63 = vshrl.u32 %v4297_v44, 16  ;;  %v929_v0 = vshll.u32 %v4298_v60, 16  ;;  %v3609_v8 = vld [vmem:[%s4696_s26 + $0x20] sm:$0xf]  ;;  %v4299_v12 = vld [vmem:[%s4696_s26 + $0x78] sm:$0xff]  ;;  %vm4941_vm8 = vmand %vm318_vm0, %vm1488_vm6 }
  0x26   : > { %v544_v39 = vsel %vm532_vm2, %v539_v36, %v543_v37  ;;  %v555_v1 = vor.u32 %v553_v61, %v551_v52  ;;  %v559_v2 = vrot.slane %v557_v62, 1  ;;  %v4287_v9 = vld [vmem:[%s4696_s26 + $0x20] sm:$0x10]  ;;  %v561_v13 = vshrl.u32 %v4286_v59, 16  ;;  %v3707_v25 = vld [vmem:[%s4696_s26 + $0x80] sm:$0xf]  ;;  %vm4962_vm13 = vmand %vm1507_vm9, %vm1508_vm10 }
  0x27   : > { %v919_v53 = vor.u32 %v918_v49, %v914_v48  ;;  %v552_v56 = vsel %vm532_vm2, %v547_v51, %v551_v52  ;;  %v927_v3 = vor.u32 %v925_v63, %v923_v54  ;;  %v931_v4 = vrot.slane %v929_v0, 1  ;;  %v3624_v28 = vld [vmem:[%s4696_s26 + $0x80] sm:$0xf]  ;;  %v4295_v36 = vld [vmem:[%s4696_s26 + $0xa8] sm:$0xff]  ;;  %v3655_v48 = vld [vmem:[%s4696_s26 + $0xb0] sm:$0xf] }
  0x28   : > { %v560_v6 = vsel %vm532_vm2, %v555_v1, %v559_v2  ;;  %v3610_v11 = vor.u32 %v4287_v9, %v3609_v8  ;;  %v933_v15 = vshrl.u32 %v4298_v60, 16  ;;  %v937_v16 = vshll.u32 %v4299_v12, 16  ;;  %v4307_v43 = vld [vmem:[%s4696_s26 + $0x3c] sm:$0xff]  ;;  %v4303_v62 = vld [vmem:[%s4696_s26 + $0x14] sm:$0xff]  ;;  %v4308_v63 = vld [vmem:[%s4696_s26 + $0x44] sm:$0xff]  ;;  %s3535_s8 = sshll.u32 %s235_s7, 6 }
  0x29   : > { %v924_v58 = vsel %vm532_vm2, %v919_v53, %v923_v54  ;;  %v932_v10 = vsel %vm532_vm2, %v927_v3, %v931_v4  ;;  %v563_v17 = vor.u32 %v561_v13, %v559_v2  ;;  %v941_v29 = vshrl.u32 %v4299_v12, 16  ;;  %v3779_v0 = vld [vmem:[%s4696_s26 + $0x4] sm:$0xe]  ;;  %v4311_v1 = vld [vmem:[%s4696_s26 + $0x4] sm:$0xf0]  ;;  %vm4967_vm14 = vmand %vm1513_vm11, %vm1514_vm12  ;;  %s5176_s9 = scalar_lea.vmem [#allocation8], %s3535_s8 }
  0x2a   : > { %v565_v14 = vshll.u32 %v3610_v11, 16  ;;  %v935_v19 = vor.u32 %v933_v15, %v931_v4  ;;  %v939_v20 = vrot.slane %v937_v16, 1  ;;  %v569_v31 = vshrl.u32 %v3610_v11, 16  ;;  %v4312_v4 = vld [vmem:[%s4696_s26 + $0xc] sm:$0xff]  ;;  %v4814_v12 = vld [vmem:[%s5226_s2] ss:$0 sm:$0xff] }
  0x2b   : > { %v679_v32 = vunpack.c.l.b16 %v3624_v28  ;;  %v1229_v51 = vshll.u32 %v4307_v43, 16  ;;  %v792_v52 = vunpack.c.l.b16 %v3655_v48  ;;  %v1083_v3 = vshll.u32 %v4303_v62, 16  ;;  %v4305_v48 = vld [vmem:[%s4696_s26 + $0x24] sm:$0x10]  ;;  %s4433_s10 = sshll.u32 %s4649_s22, 6  ;;  %s3452_s14 = sshll.u32 %s5176_s9, 4  ;;  %s3453_s14 = int_to_ptr.vmem [resolvable:$true] %s3452_s14 }
  0x2c   : > { %v567_v18 = vrot.slane %v565_v14, 1  ;;  %v943_v33 = vor.u32 %v941_v29, %v939_v20  ;;  %v1377_v11 = vrot.slane %v4312_v4, 1  ;;  %v1087_v28 = vshrl.u32 %v4303_v62, 16  ;;  %s3451_s13 = scalar_lea.hbm %s5229_s5, %s4433_s10  ;;  %s3440_s16 = scalar_lea.sflag [#allocation7], %s235_s7 }
  0x2d   : > { %v684_v37 = vpack.c.b16 %v679_v32, %v679_v32  ;;  %v1085_v9 = vrot.slane %v1083_v3, 1  ;;  %v1241_v32 = vshrl.u32 %v4308_v63, 16  ;;  %vm1534_vm0 = vsmask.f32 7950  ;;  %s3454_s15 = sshll.u32 %s3451_s13, 4  ;;  %s4544_s30 = scalar_lea.hbm %s5229_s5, 128  ;;  %s3455_s15 = int_to_ptr.hbm [resolvable:$true] %s3454_s15 }
  0x2e   : > { %3558 = vmatmul.msk.bf16.gmra.mxu2 %vm302_vm1, %v301_v22  ;;  %3555 = vmatmul.msk.bf16.gmra.mxu0 %vm302_vm1, %v4276_v23  ;;  %v568_v22 = vsel %vm532_vm2, %v563_v17, %v567_v18  ;;  %v4291_v23 = vld [vmem:[%s4696_s26 + $0x78] sm:$0xff]  ;;  %v571_v35 = vor.u32 %v569_v31, %v567_v18  ;;  %vm1539_vm4 = vcmask 1043456   ;;  %vm1540_vm5 = vsmask.f32 3328  ;;  %s4538_s17 = sshra.s32 %s3455_s15, 4  ;;  %s4539_s17 = int_to_ptr.hbm [resolvable:$true] %s4538_s17 }
  0x2f   : > { %3589 = vmatmul.msk.bf16.gmra.mxu3 %vm302_vm1, %v416_v24  ;;  %3586 = vmatmul.msk.bf16.gmra.mxu1 %vm302_vm1, %v4280_v26  ;;  %v940_v24 = vsel %vm532_vm2, %v935_v19, %v939_v20  ;;  %v4300_v26 = vld [vmem:[%s4696_s26 + $0x80] sm:$0x10]  ;;  %vm4988_vm6 = vmand %vm1539_vm4, %vm1540_vm5  ;;  %vm1558_vm9 = vsmask.f32 7938  ;;  %vm1563_vm10 = vcmask 1040384   ;;  %s4540_s22 = scalar_lea.hbm %s4539_s17, 64  ;;  %p4545_p3 = scmp.lt.s32.totalorder %s4539_s17, %s5229_s5 }
  0x30   : > { %v3708_v27 = vor.u32 %v4300_v26, %v3707_v25  ;;  %vm1564_vm11 = vsmask.f32 256  ;;  %vm4997_vm12 = vmand %vm1539_vm4, %vm1558_vm9  ;;  %p4541_p0 = scmp.ne.s32.totalorder %s4539_s17, %s4540_s22  ;;  %p4546_p4 = scmp.lt.s32.totalorder %s4544_s30, %s4540_s22 }
  0x32   : > { %v945_v30 = vshll.u32 %v3708_v27, 16  ;;  %p4542_p1 = pnand %p4541_p0, %p4666_p5  ;;  %p4547_p7 = por %p4546_p4, %p4545_p3 }
  0x34   : > { %v947_v34 = vrot.slane %v945_v30, 1  ;;  %v4313_v30 = vld [vmem:[%s4696_s26 + $0x14] sm:$0xff]  ;;  %p4543_p2 = pneg %p4542_p1 }
  0x36   : > { %p4548_p8 = pnand %p4547_p7, %p4543_p2 }
  0x3e   : > { %3611 = vmatmul.msk.bf16.vlgmr.msrb.gmra.mxu2 %vm302_vm1, %v544_v39  ;;  %3556 = vmatmul.msk.bf16.gmra.mxu0 %vm302_vm1, %v4277_v38  ;;  %v4301_v38 = vld [vmem:[%s4696_s26 + $0x4] sm:$0xff]  ;;  %v4306_v39 = vld [vmem:[%s4696_s26 + $0x34] sm:$0xff] }
  0x3f   : > { %3642 = vmatmul.msk.bf16.vlgmr.msrb.gmra.mxu3 %vm302_vm1, %v4288_v40  ;;  %3587 = vmatmul.msk.bf16.gmra.mxu1 %vm302_vm1, %v4281_v41  ;;  %v948_v40 = vsel %vm532_vm2, %v943_v33, %v947_v34  ;;  %v4302_v41 = vld [vmem:[%s4696_s26 + $0xc] sm:$0xff]  ;;  %v1070_v42 = vshll.u32 %v4301_v38, 16  ;;  %v1224_v44 = vshll.u32 %v4306_v39, 16  ;;  %v1068_v45 = vshrl.u32 %v4301_v38, 16 }
  0x40   : > { %v1075_v47 = vshll.u32 %v4302_v41, 16  ;;  %v1222_v49 = vshrl.u32 %v4306_v39, 16  ;;  %v1079_v2 = vshrl.u32 %v4302_v41, 16 }
  0x41   : > { %v1072_v46 = vrot.slane %v1070_v42, 1  ;;  %v1226_v50 = vrot.slane %v1224_v44, 1 }
  0x42   : > { %v1077_v54 = vrot.slane %v1075_v47, 1  ;;  %v3733_v47 = vld [vmem:[%s4696_s26 + $0x24] sm:$0xf] }
  0x43   : > { %v1073_v53 = vor.u32 %v1072_v46, %v1068_v45 }
  0x44   : > { %v1081_v8 = vor.u32 %v1079_v2, %v1077_v54 }
  0x45   : > { %v1078_v59 = vsel %vm532_vm2, %v1073_v53, %v1077_v54  ;;  %v3734_v53 = vor.u32 %v4305_v48, %v3733_v47 }
  0x46   : > { %v1086_v16 = vsel %vm532_vm2, %v1081_v8, %v1085_v9 }
  0x4e   : > { %3612 = vmatmul.msk.bf16.gmra.mxu2 %vm302_vm1, %v552_v56  ;;  %3673 = vmatmul.msk.bf16.vlgmr.msrb.gmra.mxu0 %vm302_vm1, %v4292_v55  ;;  %v1227_v55 = vor.u32 %v1226_v50, %v1222_v49  ;;  %v1231_v56 = vrot.slane %v1229_v51, 1  ;;  %v3769_v50 = vld [vmem:[%s4696_s26 + $0x54] sm:$0xf]  ;;  %v4310_v51 = vld [vmem:[%s4696_s26 + $0x54] sm:$0x10] }
  0x4f   : > { %3643 = vmatmul.msk.bf16.gmra.mxu3 %vm302_vm1, %v4289_v57  ;;  %3709 = vmatmul.msk.bf16.vlgmr.msrb.gmra.mxu1 %vm302_vm1, %v924_v58  ;;  %v949_v57 = vshrl.u32 %v3708_v27, 16  ;;  %v797_v58 = vpack.c.b16 %v792_v52, %v792_v52  ;;  %v3770_v54 = vor.u32 %v4310_v51, %v3769_v50 }
  0x50   : > { %v1232_v60 = vsel %vm532_vm2, %v1227_v55, %v1231_v56 }
  0x51   : > { %v951_v61 = vor.u32 %v949_v57, %v947_v34 }
  0x5e   : > { %3613 = vmatmul.msk.bf16.gmra.mxu2 %vm302_vm1, %v560_v6  ;;  %3674 = vmatmul.msk.bf16.gmra.mxu0 %vm302_vm1, %v4293_v5  ;;  %v3780_v5 = vor.u32 %v4311_v1, %v3779_v0  ;;  %v1233_v6 = vshrl.u32 %v4307_v43, 16  ;;  %v1253_v0 = vshll.u32 %v3770_v54, 16 }
  0x5f   : > { %3644 = vmatmul.msk.bf16.gmra.mxu3 %vm302_vm1, %v4290_v7  ;;  %3710 = vmatmul.msk.bf16.gmra.mxu1 %vm302_vm1, %v932_v10  ;;  %v1237_v7 = vshll.u32 %v4308_v63, 16 }
  0x60   : > { %v1376_v10 = vrot.slane %v3780_v5, 1  ;;  %v1235_v13 = vor.u32 %v1233_v6, %v1231_v56  ;;  %v1255_v6 = vrot.slane %v1253_v0, 1 }
  0x61   : > { %v1239_v14 = vrot.slane %v1237_v7, 1 }
  0x62   : > { %v1378_v17 = vsel %vm1375_vm3, %v1376_v10, %v1377_v11 }
  0x63   : > { %v1240_v19 = vsel %vm532_vm2, %v1235_v13, %v1239_v14  ;;  %v1243_v38 = vor.u32 %v1241_v32, %v1239_v14 }
  0x6e   : > { %3614 = vmatmul.msk.bf16.gmra.mxu2 %vm302_vm1, %v568_v22  ;;  %3675 = vmatmul.msk.bf16.gmra.mxu0 %vm302_vm1, %v4294_v21  ;;  %v4304_v22 = vld [vmem:[%s4696_s26 + $0x1c] sm:$0xff] }
  0x6f   : > { %3645 = vmatmul.msk.bf16.gmra.mxu3 %vm302_vm1, %v4291_v23  ;;  %3711 = vmatmul.msk.bf16.gmra.mxu1 %vm302_vm1, %v940_v24  ;;  %v4309_v23 = vld [vmem:[%s4696_s26 + $0x4c] sm:$0xff]  ;;  %v1091_v29 = vshll.u32 %v4304_v22, 16 }
  0x70   : > { %v1245_v33 = vshll.u32 %v4309_v23, 16  ;;  %v1249_v63 = vshrl.u32 %v4309_v23, 16 }
  0x72   : > { %v1247_v39 = vrot.slane %v1245_v33, 1 }
  0x74   : > { %v1248_v46 = vsel %vm532_vm2, %v1243_v38, %v1247_v39  ;;  %v1251_v5 = vor.u32 %v1249_v63, %v1247_v39  ;;  %v4327_v63 = vld [vmem:[#allocation5 + $0x30] sm:$0xff] }
  0x76   : > { %v1256_v14 = vsel %vm532_vm2, %v1251_v5, %v1255_v6 }
  0x7e   : > { %3615 = vmatmul.msk.bf16.gmra.mxu2 %vm302_vm1, %v571_v35  ;;  %3676 = vmatmul.msk.bf16.gmra.mxu0 %vm302_vm1, %v4295_v36  ;;  %v1089_v35 = vor.u32 %v1087_v28, %v1085_v9  ;;  %v1093_v36 = vrot.slane %v1091_v29, 1  ;;  %v1103_v28 = vshrl.u32 %v3734_v53, 16 }
  0x7f   : > { %3646 = vmatmul.msk.bf16.gmra.mxu3 %vm302_vm1, %v684_v37  ;;  %3712 = vmatmul.msk.bf16.gmra.mxu1 %vm302_vm1, %v948_v40  ;;  %v1379_v37 = vrot.slane %v4313_v30, 1  ;;  %v1257_v30 = vshrl.u32 %v3770_v54, 16  ;;  %v4328_v54 = vld [vmem:[#allocation5 + $0x38] sm:$0xff] }
  0x80   : > { %v1094_v43 = vsel %vm532_vm2, %v1089_v35, %v1093_v36  ;;  %1776 = vmatpush.bf16.msra.mxu1 %v4328_v54  ;;  %v4321_v54 = vld [vmem:[#allocation5] sm:$0xff] }
  0x81   : > { %v1380_v44 = vsel %vm1375_vm3, %v1377_v11, %v1379_v37  ;;  %v1259_v38 = vor.u32 %v1257_v30, %v1255_v6  ;;  %v4326_v6 = vld [vmem:[#allocation5 + $0x28] sm:$0xff]  ;;  %v4324_v30 = vld [vmem:[#allocation5 + $0x18] sm:$0xff] }
  0x84   : > { %1777 = vmatpush.bf16.msra.mxu1 %v4327_v63  ;;  %v4354_v63 = vld [vmem:[#allocation5 + $0xb8] sm:$0xff] }
  0x85   : > { %2177 = vmatpush.bf16.msrb.mxu3 %v4354_v63  ;;  %v4349_v63 = vld [vmem:[#allocation5 + $0x90] sm:$0xff] }
  0x88   : > { %1778 = vmatpush.bf16.msra.mxu1 %v4326_v6  ;;  %v4353_v6 = vld [vmem:[#allocation5 + $0xb0] sm:$0xff] }
  0x89   : > { %2178 = vmatpush.bf16.msrb.mxu3 %v4353_v6 }
  0x8e   : > { %3735 = vmatmul.msk.bf16.vlgmr.msra.gmra.mxu2 %vm302_vm1, %v1078_v59  ;;  %3677 = vmatmul.msk.bf16.gmra.mxu0 %vm302_vm1, %v797_v58  ;;  %v1095_v59 = vshrl.u32 %v4304_v22, 16 }
  0x8f   : > { %3771 = vmatmul.msk.bf16.vlgmr.msra.gmra.mxu3 %vm302_vm1, %v1232_v60  ;;  %3713 = vmatmul.msk.bf16.gmra.mxu1 %vm302_vm1, %v951_v61  ;;  %v1099_v60 = vshll.u32 %v3734_v53, 16  ;;  %v4314_v61 = vld [vmem:[%s4696_s26 + $0x1c] sm:$0xff] }
  0x90   : > { %v1097_v2 = vor.u32 %v1095_v59, %v1093_v36  ;;  %v1381_v4 = vrot.slane %v4314_v61, 1 }
  0x91   : > { %v1101_v3 = vrot.slane %v1099_v60, 1 }
  0x92   : > { %v1382_v11 = vsel %vm1375_vm3, %v1379_v37, %v1381_v4 }
  0x93   : > { %v1102_v10 = vsel %vm532_vm2, %v1097_v2, %v1101_v3  ;;  %v1105_v35 = vor.u32 %v1103_v28, %v1101_v3  ;;  %v4595_v28 = vmov 0  }
  0x94   : > { %1454 = vst [vmem:[#allocation3] sm:$0xf] %v4595_v28 }
  0x95   : > { %1455 = vst [vmem:[#allocation3 + $0x4] sm:$0xf] %v4595_v28 }
  0x96   : > { %1456 = vst [vmem:[#allocation3 + $0x8] sm:$0xf] %v4595_v28 }
  0x97   : > { %1457 = vst [vmem:[#allocation3 + $0xc] sm:$0xf] %v4595_v28 }
  0x98   : > { %1458 = vst [vmem:[#allocation3 + $0x10] sm:$0xf] %v4595_v28 }
  0x99   : > { %1459 = vst [vmem:[#allocation3 + $0x14] sm:$0xf] %v4595_v28 }
  0x9a   : > { %1460 = vst [vmem:[#allocation3 + $0x18] sm:$0xf] %v4595_v28 }
  0x9b   : > { %v331_v15 = vpop.f32.mrf.mxu0  ;;  %1461 = vst [vmem:[#allocation3 + $0x1c] sm:$0xf] %v4595_v28 }
  0x9c   : > { %v355_v18 = vadd.f32 %v4814_v12, %v331_v15  ;;  %v444_v20 = vpop.f32.mrf.mxu1  ;;  %1462 = vst [vmem:[#allocation3 + $0x20] sm:$0xf] %v4595_v28 }
  0x9d   : > { %1463 = vst [vmem:[#allocation3 + $0x24] sm:$0xf] %v4595_v28 }
  0x9e   : > { %3736 = vmatmul.msk.bf16.gmra.mxu2 %vm302_vm1, %v1086_v16  ;;  %3797 = vmatmul.msk.bf16.vlgmr.msra.gmra.mxu0 %vm302_vm1, %v1378_v17  ;;  %v4822_v21 = vadd.f32 %v444_v20, %v355_v18  ;;  %v3795_v17 = vld [vmem:[%s4696_s26 + $0x24] sm:$0xf]  ;;  %v4315_v18 = vld [vmem:[%s4696_s26 + $0x24] sm:$0x10]  ;;  %1464 = vst [vmem:[#allocation3 + $0x28] sm:$0xf] %v4595_v28 }
  0x9f   : > { %3772 = vmatmul.msk.bf16.gmra.mxu3 %vm302_vm1, %v1240_v19  ;;  %1465 = vst [vmem:[#allocation3 + $0x2c] sm:$0xf] %v4595_v28 }
  0xa0   : > { %1466 = vst [vmem:[#allocation3 + $0x30] sm:$0xf] %v4595_v28 }
  0xa1   : > { %v346_v24 = vpop.f32.mrf.mxu2 }
  0xa2   : > { %v361_v25 = vadd.f32 %v4814_v12, %v346_v24  ;;  %v459_v26 = vpop.f32.mrf.mxu3  ;;  %v3796_v24 = vor.u32 %v4315_v18, %v3795_v17  ;;  %v4325_v18 = vld [vmem:[#allocation5 + $0x20] sm:$0xff] }
  0xa3   : > { %v4828_v27 = vpop.f32.mrf.mxu0  ;;  %1779 = vmatpush.bf16.msra.mxu1 %v4325_v18 }
  0xa4   : > { %v4831_v31 = vadd.f32 %v459_v26, %v361_v25  ;;  %v4833_v34 = vpop.f32.mrf.mxu1  ;;  %v1383_v29 = vrot.slane %v3796_v24, 1 }
  0xa6   : > { %v1384_v37 = vsel %vm1375_vm3, %v1381_v4, %v1383_v29 }
  0xa7   : > { %1780 = vmatpush.bf16.msra.mxu1 %v4324_v30 }
  0xa9   : > { %v4835_v40 = vpop.f32.mrf.mxu2 }
  0xaa   : > { %v4837_v41 = vpop.f32.mrf.mxu3 }
  0xab   : > { %v336_v42 = vpop.f32.mrf.mxu0 }
  0xac   : > { %v357_v45 = vadd.f32 %v4814_v12, %v336_v42  ;;  %v449_v49 = vpop.f32.mrf.mxu1 }
  0xae   : > { %3737 = vmatmul.msk.bf16.gmra.mxu2 %vm302_vm1, %v1094_v43  ;;  %3798 = vmatmul.msk.bf16.gmra.mxu0 %vm302_vm1, %v1380_v44  ;;  %v470_v52 = vadd.f32 %v449_v49, %v357_v45 }
  0xaf   : > { %3773 = vmatmul.msk.bf16.gmra.mxu3 %vm302_vm1, %v1248_v46 }
  0xb1   : > { %v351_v55 = vpop.f32.mrf.mxu2 }
  0xb2   : > { %v363_v56 = vadd.f32 %v4814_v12, %v351_v55  ;;  %v464_v57 = vpop.f32.mrf.mxu3 }
  0xb3   : > { %v4851_v58 = vpop.f32.mrf.mxu0 }
  0xb4   : > { %v4854_v62 = vadd.f32 %v464_v57, %v363_v56  ;;  %v4856_v1 = vpop.f32.mrf.mxu1 }
  0xb9   : > { %v353_v7 = vpop.f32.mrf.mxu2 }
  0xba   : > { %v466_v8 = vpop.f32.mrf.mxu3 }
  0xbb   : > { %v341_v9 = vpop.f32.mrf.mxu0 }
  0xbc   : > { %v359_v13 = vadd.f32 %v4814_v12, %v341_v9  ;;  %v454_v15 = vpop.f32.mrf.mxu1 }
  0xbe   : > { %3738 = vmatmul.msk.bf16.gmra.mxu2 %vm302_vm1, %v1102_v10  ;;  %3799 = vmatmul.msk.bf16.gmra.mxu0 %vm302_vm1, %v1382_v11  ;;  %v472_v16 = vadd.f32 %v454_v15, %v359_v13 }
  0xbf   : > { %3774 = vmatmul.msk.bf16.gmra.mxu3 %vm302_vm1, %v1256_v14 }
  0xc1   : > { %v599_v19 = vpop.f32.mrf.mxu2 }
  0xc2   : > { %v623_v20 = vadd.f32 %v599_v19, %v4822_v21  ;;  %v712_v22 = vpop.f32.mrf.mxu3 }
  0xc3   : > { %v4868_v23 = vpop.f32.mrf.mxu0 }
  0xc4   : > { %v736_v25 = vadd.f32 %v712_v22, %v623_v20  ;;  %v4870_v26 = vpop.f32.mrf.mxu1 }
  0xc9   : > { %v4872_v32 = vpop.f32.mrf.mxu2 }
  0xca   : > { %v4874_v33 = vpop.f32.mrf.mxu3 }
  0xcb   : > { %v825_v36 = vpop.f32.mrf.mxu0 }
  0xcc   : > { %v849_v21 = vadd.f32 %v825_v36, %v736_v25  ;;  %v979_v39 = vpop.f32.mrf.mxu1 }
  0xce   : > { %3739 = vmatmul.msk.bf16.gmra.mxu2 %vm302_vm1, %v1105_v35  ;;  %3800 = vmatmul.msk.bf16.gmra.mxu0 %vm302_vm1, %v1384_v37  ;;  %v4879_v42 = vadd.f32 %v979_v39, %v849_v21  ;;  %v4323_v21 = vld [vmem:[#allocation5 + $0x10] sm:$0xff] }
  0xcf   : > { %3775 = vmatmul.msk.bf16.gmra.mxu3 %vm302_vm1, %v1259_v38  ;;  %v4341_v38 = vld [vmem:[#allocation5 + $0x78] sm:$0xff]  ;;  %1781 = vmatpush.bf16.msra.mxu1 %v4323_v21 }
  0xd0   : > { %1993 = vmatpush.bf16.msrb.mxu2 %v4341_v38  ;;  %v4338_v38 = vld [vmem:[#allocation5 + $0x60] sm:$0xff] }
  0xd1   : > { %v604_v43 = vpop.f32.mrf.mxu2 }
  0xd2   : > { %v625_v44 = vadd.f32 %v604_v43, %v470_v52  ;;  %v717_v45 = vpop.f32.mrf.mxu3  ;;  %v4322_v43 = vld [vmem:[#allocation5 + $0x8] sm:$0xff] }
  0xd3   : > { %v4882_v46 = vpop.f32.mrf.mxu0  ;;  %1782 = vmatpush.bf16.msra.mxu1 %v4322_v43 }
  0xd4   : > { %v738_v47 = vadd.f32 %v717_v45, %v625_v44  ;;  %v4884_v48 = vpop.f32.mrf.mxu1  ;;  %v356_v45 = vadd.f32 %v4814_v12, %v4828_v27 }
  0xd7   : > { %1783 = vmatpush.bf16.msra.mxu1 %v4321_v54  ;;  %v1484_v54 = vld [vmem:[#allocation3 + $0x4] sm:$0xe] }
  0xd9   : > { %v4886_v49 = vpop.f32.mrf.mxu2 }
  0xda   : > { %v4888_v50 = vpop.f32.mrf.mxu3 }
  0xdb   : > { %v830_v51 = vpop.f32.mrf.mxu0 }
  0xdc   : > { %v851_v53 = vadd.f32 %v830_v51, %v738_v47  ;;  %v984_v55 = vpop.f32.mrf.mxu1 }
  0xde   : > { %3801 = vmatmul.msk.bf16.gmra.mxu0 %vm302_vm1, %v1383_v29  ;;  %v4891_v56 = vadd.f32 %v984_v55, %v851_v53  ;;  %v469_v55 = vadd.f32 %v4833_v34, %v356_v45  ;;  %vm4977_vm1 = vmand %vm1533_vm15, %vm1534_vm0 }
  0xdf   : > { %vm5004_vm15 = vmand %vm1563_vm10, %vm1564_vm11 }
  0xe1   : > { %v609_v52 = vpop.f32.mrf.mxu2 }
  0xe2   : > { %v627_v57 = vadd.f32 %v609_v52, %v472_v16  ;;  %v722_v59 = vpop.f32.mrf.mxu3 }
  0xe3   : > { %v4893_v60 = vpop.f32.mrf.mxu0 }
  0xe4   : > { %v740_v61 = vadd.f32 %v722_v59, %v627_v57  ;;  %v4895_v0 = vpop.f32.mrf.mxu1  ;;  %v624_v57 = vadd.f32 %v4872_v32, %v469_v55  ;;  %v358_v32 = vadd.f32 %v4814_v12, %v4851_v58  ;;  %v4337_v55 = vld [vmem:[#allocation5 + $0x58] sm:$0xff] }
  0xe6   : > { %v737_v27 = vadd.f32 %v4874_v33, %v624_v57  ;;  %v471_v28 = vadd.f32 %v4856_v1, %v358_v32  ;;  %v4364_v1 = vld [vmem:[#allocation5 + $0xe0] sm:$0xff]  ;;  %v4362_v32 = vld [vmem:[#allocation5 + $0xd0] sm:$0xff] }
  0xe8   : > { %v626_v58 = vadd.f32 %v4886_v49, %v471_v28 }
  0xe9   : > { %v4897_v2 = vpop.f32.mrf.mxu2 }
  0xea   : > { %v4899_v3 = vpop.f32.mrf.mxu3 }
  0xeb   : > { %v835_v4 = vpop.f32.mrf.mxu0 }
  0xec   : > { %v853_v5 = vadd.f32 %v835_v4, %v740_v61  ;;  %v989_v7 = vpop.f32.mrf.mxu1 }
  0xee   : > { %v4901_v8 = vadd.f32 %v989_v7, %v853_v5  ;;  %v4367_v7 = vld [vmem:[#allocation5 + $0xf8] sm:$0xff] }
  0xef   : > { %2361 = vmatpush.bf16.msrb.mxu0 %v4367_v7 }
  0xf1   : > { %v614_v9 = vpop.f32.mrf.mxu2 }
  0xf2   : > { %v629_v10 = vadd.f32 %v614_v9, %v4831_v31  ;;  %v727_v11 = vpop.f32.mrf.mxu3  ;;  %v850_v9 = vadd.f32 %v4882_v46, %v737_v27  ;;  %v1490_v27 = vld [vmem:[#allocation3 + $0x8] sm:$0x3] }
  0xf3   : > { %v4904_v13 = vpop.f32.mrf.mxu0 }
  0xf4   : > { %v742_v14 = vadd.f32 %v727_v11, %v629_v10  ;;  %v4906_v15 = vpop.f32.mrf.mxu1  ;;  %v4340_v11 = vld [vmem:[#allocation5 + $0x70] sm:$0xff]  ;;  %v1004_v33 = vadd.f32 %v4884_v48, %v850_v9 }
  0xf5   : > { %1994 = vmatpush.bf16.msrb.mxu2 %v4340_v11 }
  0xf9   : > { %v4908_v16 = vpop.f32.mrf.mxu2 }
  0xfa   : > { %v4910_v17 = vpop.f32.mrf.mxu3 }
  0xfb   : > { %v840_v19 = vpop.f32.mrf.mxu0 }
  0xfc   : > { %v855_v20 = vadd.f32 %v840_v19, %v742_v14  ;;  %v994_v22 = vpop.f32.mrf.mxu1  ;;  %v4352_v19 = vld [vmem:[#allocation5 + $0xa8] sm:$0xff] }
  0xfd   : > { %2179 = vmatpush.bf16.msrb.mxu3 %v4352_v19 }
  0xfe   : > { %v4912_v24 = vadd.f32 %v994_v22, %v855_v20  ;;  %v4366_v20 = vld [vmem:[#allocation5 + $0xf0] sm:$0xff]  ;;  %v4339_v22 = vld [vmem:[#allocation5 + $0x68] sm:$0xff] }
  0xff   : > { %2362 = vmatpush.bf16.msrb.mxu0 %v4366_v20  ;;  %1995 = vmatpush.bf16.msrb.mxu2 %v4339_v22  ;;  %v4335_v20 = vld [vmem:[#allocation5 + $0x48] sm:$0xff]  ;;  %v4347_v22 = vld [vmem:[#allocation5 + $0x80] sm:$0xff] }
 0x101   : > { %v619_v25 = vpop.f32.mrf.mxu2 }
 0x102   : > { %v631_v31 = vadd.f32 %v619_v25, %v4854_v62  ;;  %v732_v29 = vpop.f32.mrf.mxu3 }
 0x103   : > { %v4915_v35 = vpop.f32.mrf.mxu0  ;;  %1996 = vmatpush.bf16.msrb.mxu2 %v4338_v38 }
 0x104   : > { %v744_v36 = vadd.f32 %v732_v29, %v631_v31  ;;  %v4917_v37 = vpop.f32.mrf.mxu1  ;;  %v4351_v31 = vld [vmem:[#allocation5 + $0xa0] sm:$0xff]  ;;  %v4365_v29 = vld [vmem:[#allocation5 + $0xe8] sm:$0xff] }
 0x105   : > { %2180 = vmatpush.bf16.msrb.mxu3 %v4351_v31  ;;  %2363 = vmatpush.bf16.msrb.mxu0 %v4365_v29  ;;  %v4334_v31 = vld [vmem:[#allocation5 + $0x40] sm:$0xff] }
 0x107   : > { %1997 = vmatpush.bf16.msrb.mxu2 %v4337_v55 }
 0x109   : > { %v621_v62 = vpop.f32.mrf.mxu2  ;;  %2364 = vmatpush.bf16.msrb.mxu0 %v4364_v1 }
 0x10a   : > { %v734_v39 = vpop.f32.mrf.mxu3 }
 0x10b   : > { %v845_v44 = vpop.f32.mrf.mxu0 }
 0x10c   : > { %v857_v47 = vadd.f32 %v845_v44, %v744_v36  ;;  %v999_v51 = vpop.f32.mrf.mxu1  ;;  %v4350_v44 = vld [vmem:[#allocation5 + $0x98] sm:$0xff] }
 0x10d   : > { %2181 = vmatpush.bf16.msrb.mxu3 %v4350_v44 }
 0x10e   : > { %v4921_v53 = vadd.f32 %v999_v51, %v857_v47 }
 0x111   : > { %v1133_v52 = vpop.f32.mrf.mxu2  ;;  %2182 = vmatpush.bf16.msrb.mxu3 %v4349_v63 }
 0x112   : > { %v1287_v59 = vpop.f32.mrf.mxu3  ;;  %v1157_v5 = vadd.f32 %v1133_v52, %v4879_v42  ;;  %v739_v52 = vadd.f32 %v4888_v50, %v626_v58  ;;  %v4360_v58 = vld [vmem:[#allocation5 + $0xc0] sm:$0xff] }
 0x113   : > { %v847_v61 = vpop.f32.mrf.mxu0 }
 0x114   : > { %v1001_v4 = vpop.f32.mrf.mxu1  ;;  %v1311_v34 = vadd.f32 %v1287_v59, %v1157_v5  ;;  %v852_v5 = vadd.f32 %v4893_v60, %v739_v52  ;;  %v4348_v60 = vld [vmem:[#allocation5 + $0x88] sm:$0xff] }
 0x115   : > { %v4363_v4 = vld [vmem:[#allocation5 + $0xd8] sm:$0xff]  ;;  %2183 = vmatpush.bf16.msrb.mxu3 %v4348_v60 }
 0x116   : > { %2365 = vmatpush.bf16.msrb.mxu0 %v4363_v4 }
 0x119   : > { %v1135_v10 = vpop.f32.mrf.mxu2  ;;  %2184 = vmatpush.bf16.msrb.mxu3 %v4347_v22 }
 0x11a   : > { %v1289_v14 = vpop.f32.mrf.mxu3  ;;  %v1158_v46 = vadd.f32 %v1135_v10, %v1004_v33  ;;  %2366 = vmatpush.bf16.msrb.mxu0 %v4362_v32  ;;  %v4390_v32 = vld [vmem:[#allocation5 + $0x160] sm:$0xff] }
 0x11b   : > { %v1412_v18 = vpop.f32.mrf.mxu0 }
 0x11c   : > { %v1436_v42 = vadd.f32 %v1412_v18, %v1311_v34  ;;  %v1312_v48 = vadd.f32 %v1289_v14, %v1158_v46  ;;  %v360_v34 = vadd.f32 %v4814_v12, %v4868_v23  ;;  %v1006_v18 = vadd.f32 %v4895_v0, %v852_v5  ;;  %v4361_v46 = vld [vmem:[#allocation5 + $0xc8] sm:$0xff] }
 0x11e   : > { %v1468_v25 = vmax.f32 %v1436_v42, 0.0  ;;  %v473_v42 = vadd.f32 %v4870_v26, %v360_v34  ;;  %2367 = vmatpush.bf16.msrb.mxu0 %v4361_v46 }
 0x120   : > { %v1469_v30 = vpack.c.bf16 %v1468_v25, %v1468_v25  ;;  %v628_v23 = vadd.f32 %v4897_v2, %v473_v42  ;;  %v4380_v2 = vld [vmem:[#allocation5 + $0x138] sm:$0xff] }
 0x121   : > { %v1138_v36 = vpop.f32.mrf.mxu2  ;;  %2588 = vmatpush.bf16.msrb.mxu1 %v4380_v2 }
 0x122   : > { %v1471_v21 = vshrl.u32 %v1469_v30, 16  ;;  %v1474_v62 = vshll.u32 %v1469_v30, 16  ;;  %v1292_v39 = vpop.f32.mrf.mxu3  ;;  %v1159_v59 = vadd.f32 %v1138_v36, %v4891_v56  ;;  %v4336_v56 = vld [vmem:[#allocation5 + $0x50] sm:$0xff]  ;;  %v741_v38 = vadd.f32 %v4899_v3, %v628_v23  ;;  %2368 = vmatpush.bf16.msrb.mxu0 %v4360_v58 }
 0x123   : > { %v1414_v43 = vpop.f32.mrf.mxu0  ;;  %1998 = vmatpush.bf16.msrb.mxu2 %v4336_v56  ;;  %v362_v3 = vadd.f32 %v4814_v12, %v4835_v40 }
 0x124   : > { %v1473_v45 = vrot.slane %v1471_v21, 6  ;;  %v1476_v47 = vrot.slane %v1474_v62, 7  ;;  %v1437_v51 = vadd.f32 %v1414_v43, %v1312_v48  ;;  %v1313_v9 = vadd.f32 %v1292_v39, %v1159_v59  ;;  %v1510_v59 = vld [vmem:[#allocation3 + $0x8] sm:$0xc] }
 0x125   : > { %v854_v62 = vadd.f32 %v4904_v13, %v741_v38  ;;  %v475_v12 = vadd.f32 %v4837_v41, %v362_v3  ;;  %v1560_v3 = vld [vmem:[#allocation3 + $0x14] sm:$0xf] }
 0x126   : > { %v1477_v57 = vor.u32 %v1476_v47, %v1473_v45  ;;  %1446 = vst [vmem:[#allocation2 + $0x8] sm:$0xff] %v1437_v51 }
 0x127   : > { %1999 = vmatpush.bf16.msrb.mxu2 %v4335_v20  ;;  %v1008_v51 = vadd.f32 %v4906_v15, %v854_v62  ;;  %v1516_v15 = vld [vmem:[#allocation3 + $0xc] sm:$0x7]  ;;  %v630_v56 = vadd.f32 %v4908_v16, %v475_v12 }
 0x128   : > { %v1485_v6 = vsel %vm4934_vm7, %v1477_v57, %v1484_v54  ;;  %v1478_v7 = vrot.slane %v1477_v57, 4  ;;  %v1623_v57 = vld [vmem:[#allocation3 + $0x20] sm:$0x8] }
 0x129   : > { %v1140_v50 = vpop.f32.mrf.mxu2  ;;  %1486 = vst [vmem:[#allocation3 + $0x4] sm:$0xe] %v1485_v6  ;;  %v4379_v6 = vld [vmem:[#allocation5 + $0x130] sm:$0xff] }
 0x12a   : > { %v1294_v10 = vpop.f32.mrf.mxu3  ;;  %v1491_v11 = vsel %vm4941_vm8, %v1478_v7, %v1490_v27  ;;  %v1160_v33 = vadd.f32 %v1140_v50, %v1006_v18  ;;  %2589 = vmatpush.bf16.msrb.mxu1 %v4379_v6  ;;  %v1536_v18 = vld [vmem:[#allocation3 + $0xc] sm:$0x8] }
 0x12b   : > { %v1417_v14 = vpop.f32.mrf.mxu0  ;;  %1492 = vst [vmem:[#allocation3 + $0x8] sm:$0x3] %v1491_v11  ;;  %2000 = vmatpush.bf16.msrb.mxu2 %v4334_v31 }
 0x12c   : > { %v1438_v19 = vadd.f32 %v1417_v14, %v1313_v9  ;;  %v1314_v29 = vadd.f32 %v1294_v10, %v1160_v33  ;;  %v743_v33 = vadd.f32 %v4910_v17, %v630_v56 }
 0x12e   : > { %1447 = vst [vmem:[#allocation2 + $0x10] sm:$0xff] %v1438_v19  ;;  %v856_v17 = vadd.f32 %v4915_v35, %v743_v33 }
 0x130   : > { %v4316_v25 = vld [vmem:[#allocation3] sm:$0xff] }
 0x131   : > { %v1143_v28 = vpop.f32.mrf.mxu2  ;;  %1784 = vmatmul.bf16.vlgmr.msra.gmra.mxu1 %v4316_v25  ;;  %v4985_v31 = vld [vmem:[#allocation3] sm:$0xff] }
 0x132   : > { %v1297_v0 = vpop.f32.mrf.mxu3  ;;  %v1161_v21 = vadd.f32 %v1143_v28, %v4901_v8  ;;  %v3908_v28 = vld [vmem:[#allocation3] sm:$0xe]  ;;  %v3960_v56 = vld [vmem:[#allocation3 + $0x4] sm:$0xe] }
 0x133   : > { %v1419_v30 = vpop.f32.mrf.mxu0 }
 0x134   : > { %v1439_v36 = vadd.f32 %v1419_v30, %v1314_v29  ;;  %v1315_v45 = vadd.f32 %v1297_v0, %v1161_v21  ;;  %v1542_v0 = vld [vmem:[#allocation3 + $0x10] sm:$0xf] }
 0x135   : > { %v1493_v26 = vld [vmem:[#allocation2 + $0x9] sm:$0xff] }
 0x136   : > { %v1494_v48 = vmax.f32 %v1493_v26, 0.0  ;;  %1448 = vst [vmem:[#allocation2 + $0x18] sm:$0xff] %v1439_v36  ;;  %v4378_v36 = vld [vmem:[#allocation5 + $0x128] sm:$0xff] }
 0x137   : > { %2590 = vmatpush.bf16.msrb.mxu1 %v4378_v36  ;;  %v4375_v36 = vld [vmem:[#allocation5 + $0x110] sm:$0xff] }
 0x138   : > { %v1495_v39 = vpack.c.bf16 %v1494_v48, %v1494_v48 }
 0x139   : > { %v1145_v43 = vpop.f32.mrf.mxu2 }
 0x13a   : > { %v1497_v44 = vshrl.u32 %v1495_v39, 16  ;;  %v1500_v1 = vshll.u32 %v1495_v39, 16  ;;  %v1299_v47 = vpop.f32.mrf.mxu3  ;;  %v1162_v27 = vadd.f32 %v1145_v43, %v1008_v51  ;;  %v1899_v43 = vshll.u32 %v4985_v31, 16  ;;  %v4402_v51 = vld [vmem:[#allocation5 + $0x198] sm:$0xff] }
 0x13b   : > { %v1422_v54 = vpop.f32.mrf.mxu0 }
 0x13c   : > { %v1499_v8 = vrot.slane %v1497_v44, 5  ;;  %v1502_v55 = vrot.slane %v1500_v1, 6  ;;  %v1440_v52 = vadd.f32 %v1422_v54, %v1315_v45  ;;  %v1316_v41 = vadd.f32 %v1299_v47, %v1162_v27 }
 0x13d   : > { %v1519_v13 = vld [vmem:[#allocation2 + $0x12] sm:$0xff]  ;;  %v1010_v44 = vadd.f32 %v4917_v37, %v856_v17 }
 0x13e   : > { %v1503_v63 = vor.u32 %v1502_v55, %v1499_v8  ;;  %v1520_v4 = vmax.f32 %v1519_v13, 0.0  ;;  %1449 = vst [vmem:[#allocation2 + $0x20] sm:$0xff] %v1440_v52  ;;  %v1566_v55 = vld [vmem:[#allocation3 + $0x18] sm:$0x1] }
 0x140   : > { %v1521_v5 = vpack.c.bf16 %v1520_v4, %v1520_v4  ;;  %v1504_v7 = vrot.slane %v1503_v63, 4  ;;  %v1511_v50 = vsel %vm4962_vm13, %v1503_v63, %v1510_v59 }
 0x141   : > { %v1148_v9 = vpop.f32.mrf.mxu2  ;;  %1512 = vst [vmem:[#allocation3 + $0x8] sm:$0xc] %v1511_v50 }
 0x142   : > { %v1523_v10 = vshll.u32 %v1521_v5, 16  ;;  %v1526_v11 = vshrl.u32 %v1521_v5, 16  ;;  %v1302_v34 = vpop.f32.mrf.mxu3  ;;  %v1517_v14 = vsel %vm4967_vm14, %v1504_v7, %v1516_v15  ;;  %v1163_v46 = vadd.f32 %v1148_v9, %v4912_v24  ;;  %v4342_v24 = vld [vmem:[#allocation3] sm:$0xf0] }
 0x143   : > { %v1424_v60 = vpop.f32.mrf.mxu0  ;;  %1518 = vst [vmem:[#allocation3 + $0xc] sm:$0x7] %v1517_v14  ;;  %v3909_v39 = vor.u32 %v4342_v24, %v3908_v28  ;;  %v1901_v15 = vrot.slane %v1899_v43, 1  ;;  %v4377_v5 = vld [vmem:[#allocation5 + $0x120] sm:$0xff]  ;;  %v4376_v14 = vld [vmem:[#allocation5 + $0x118] sm:$0xff] }
 0x144   : > { %v1525_v16 = vrot.slane %v1523_v10, 5  ;;  %v1528_v19 = vrot.slane %v1526_v11, 4  ;;  %v1441_v20 = vadd.f32 %v1424_v60, %v1316_v41  ;;  %v1317_v48 = vadd.f32 %v1302_v34, %v1163_v46  ;;  %2591 = vmatpush.bf16.msrb.mxu1 %v4377_v5  ;;  %v4393_v60 = vld [vmem:[#allocation5 + $0x178] sm:$0xff]  ;;  %v1583_v24 = vld [vmem:[#allocation3 + $0x18] sm:$0xe] }
 0x145   : > { %v1545_v42 = vld [vmem:[#allocation2 + $0x1b] sm:$0xff]  ;;  %v2113_v12 = vrot.slane %v3909_v39, 1  ;;  %v1897_v11 = vshrl.u32 %v4985_v31, 16  ;;  %2773 = vmatpush.bf16.msra.mxu2 %v4393_v60  ;;  %v1603_v5 = vld [vmem:[#allocation3 + $0x1c] sm:$0xc] }
 0x146   : > { %v1529_v22 = vor.u32 %v1528_v19, %v1525_v16  ;;  %v1546_v25 = vmax.f32 %v1545_v42, 0.0  ;;  %1450 = vst [vmem:[#allocation2 + $0x28] sm:$0xff] %v1441_v20  ;;  %v1537_v23 = vsel %vm4977_vm1, %v1525_v16, %v1536_v18  ;;  %v4405_v60 = vld [vmem:[#allocation5 + $0x1b0] sm:$0xff] }
 0x147   : > { %1538 = vst [vmem:[#allocation3 + $0xc] sm:$0x8] %v1537_v23  ;;  %v1902_v46 = vor.u32 %v1901_v15, %v1897_v11 }
 0x148   : > { %v1530_v30 = vrot.slane %v1529_v22, 4  ;;  %v1547_v58 = vpack.c.bf16 %v1546_v25, %v1546_v25  ;;  %v4355_v8 = vld [vmem:[#allocation3 + $0x4] sm:$0xf0]  ;;  %2592 = vmatpush.bf16.msrb.mxu1 %v4376_v14  ;;  %v4391_v14 = vld [vmem:[#allocation5 + $0x168] sm:$0xff] }
 0x149   : > { %v1150_v38 = vpop.f32.mrf.mxu2  ;;  %v3961_v41 = vor.u32 %v4355_v8, %v3960_v56 }
 0x14a   : > { %v1549_v26 = vshrl.u32 %v1547_v58, 16  ;;  %v1304_v21 = vpop.f32.mrf.mxu3  ;;  %v1543_v2 = vsel %vm4988_vm6, %v1530_v30, %v1542_v0  ;;  %v1552_v45 = vshll.u32 %v1547_v58, 16  ;;  %v1164_v59 = vadd.f32 %v1150_v38, %v1010_v44 }
 0x14b   : > { %v1427_v62 = vpop.f32.mrf.mxu0  ;;  %1544 = vst [vmem:[#allocation3 + $0x10] sm:$0xf] %v1543_v2  ;;  %v2297_v30 = vrot.slane %v3961_v41, 1  ;;  %v4406_v2 = vld [vmem:[#allocation5 + $0x1b8] sm:$0xff] }
 0x14c   : > { %v1551_v1 = vrot.slane %v1549_v26, 7  ;;  %v1442_v47 = vadd.f32 %v1427_v62, %v1317_v48  ;;  %v1318_v19 = vadd.f32 %v1304_v21, %v1164_v59  ;;  %v4392_v21 = vld [vmem:[#allocation5 + $0x170] sm:$0xff]  ;;  %2593 = vmatpush.bf16.msrb.mxu1 %v4375_v36  ;;  %2957 = vmatpush.bf16.msra.mxu3 %v4406_v2 }
 0x14d   : > { %v1569_v54 = vld [vmem:[#allocation2 + $0x24] sm:$0xff]  ;;  %2774 = vmatpush.bf16.msra.mxu2 %v4392_v21  ;;  %v4404_v21 = vld [vmem:[#allocation5 + $0x1a8] sm:$0xff]  ;;  %v4418_v2 = vld [vmem:[#allocation5 + $0x1f0] sm:$0xff] }
 0x14e   : > { %v1554_v52 = vor.u32 %v1552_v45, %v1551_v1  ;;  %v1555_v13 = vrot.slane %v1551_v1, 4  ;;  %v1570_v63 = vmax.f32 %v1569_v54, 0.0  ;;  %1451 = vst [vmem:[#allocation2 + $0x30] sm:$0xff] %v1442_v47  ;;  %v4317_v4 = vld [vmem:[#allocation3 + $0x8] sm:$0xff]  ;;  %v1586_v1 = vld [vmem:[#allocation3 + $0x1c] sm:$0x3] }
 0x14f   : > { %v5008_v37 = vld [vmem:[#allocation3 + $0x8] sm:$0xff]  ;;  %1789 = vmatmul.bf16.gmra.mxu1 %v4317_v4 }
 0x150   : > { %v5010_v27 = vld [vmem:[#allocation3 + $0x8] sm:$0xff]  ;;  %v1571_v6 = vpack.c.bf16 %v1570_v63, %v1570_v63  ;;  %v2114_v7 = vrot.slane %v5008_v37, 1  ;;  %v1561_v9 = vsel %vm4997_vm12, %v1554_v52, %v1560_v3  ;;  %v1567_v34 = vsel %vm5004_vm15, %v1555_v13, %v1566_v55  ;;  %2958 = vmatpush.bf16.msra.mxu3 %v4405_v60  ;;  %v4414_v60 = vld [vmem:[#allocation5 + $0x1d0] sm:$0xff] }
 0x151   : > { %v1904_v50 = vshll.u32 %v5010_v27, 16  ;;  %v1153_v10 = vpop.f32.mrf.mxu2  ;;  %1562 = vst [vmem:[#allocation3 + $0x14] sm:$0xf] %v1561_v9  ;;  %v4374_v47 = vld [vmem:[#allocation5 + $0x108] sm:$0xff]  ;;  %2775 = vmatpush.bf16.msra.mxu2 %v4391_v14 }
 0x152   : > { %v1573_v18 = vshrl.u32 %v1571_v6, 16  ;;  %v1576_v16 = vshll.u32 %v1571_v6, 16  ;;  %v1307_v20 = vpop.f32.mrf.mxu3  ;;  %v2115_v33 = vsel %vm1375_vm3, %v2113_v12, %v2114_v7  ;;  %v5022_v42 = vld [vmem:[#allocation3 + $0xc] sm:$0xff]  ;;  %1568 = vst [vmem:[#allocation3 + $0x18] sm:$0x1] %v1567_v34  ;;  %v1165_v26 = vadd.f32 %v1153_v10, %v4921_v53  ;;  %2594 = vmatpush.bf16.msrb.mxu1 %v4374_v47 }
 0x153   : > { %v1429_v22 = vpop.f32.mrf.mxu0  ;;  %2185 = vmatmul.bf16.vlgmr.msrb.gmra.mxu3 %v2115_v33  ;;  %v5024_v25 = vrot.slane %v1904_v50, 1  ;;  %v2298_v58 = vrot.slane %v5022_v42, 1  ;;  %v1606_v10 = vld [vmem:[#allocation3 + $0x20] sm:$0x7]  ;;  %v4400_v14 = vld [vmem:[#allocation5 + $0x188] sm:$0xff] }
 0x154   : > { %v1575_v23 = vrot.slane %v1573_v18, 6  ;;  %v1578_v28 = vrot.slane %v1576_v16, 7  ;;  %v1443_v31 = vadd.f32 %v1429_v22, %v1318_v19  ;;  %v1319_v8 = vadd.f32 %v1307_v20, %v1165_v26  ;;  %2959 = vmatpush.bf16.msra.mxu3 %v4404_v21 }
 0x155   : > { %v1589_v0 = vld [vmem:[#allocation2 + $0x2d] sm:$0xff]  ;;  %v1907_v17 = vsel %vm532_vm2, %v1902_v46, %v5024_v25  ;;  %v2299_v62 = vsel %vm1375_vm3, %v2297_v30, %v2298_v58  ;;  %v1908_v18 = vshrl.u32 %v5010_v27, 16  ;;  %2776 = vmatpush.bf16.msra.mxu2 %v4390_v32 }
 0x156   : > { %v1579_v38 = vor.u32 %v1578_v28, %v1575_v23  ;;  %v1590_v48 = vmax.f32 %v1589_v0, 0.0  ;;  %1452 = vst [vmem:[#allocation2 + $0x38] sm:$0xff] %v1443_v31  ;;  %2001 = vmatmul.bf16.vlgmr.msrb.gmra.mxu2 %v1907_v17  ;;  %2369 = vmatmul.bf16.vlgmr.msrb.gmra.mxu0 %v2299_v62  ;;  %v4373_v30 = vld [vmem:[#allocation5 + $0x100] sm:$0xff] }
 0x157   : > { %v1910_v27 = vor.u32 %v1908_v18, %v5024_v25  ;;  %2595 = vmatpush.bf16.msrb.mxu1 %v4373_v30 }
 0x158   : > { %v1591_v39 = vpack.c.bf16 %v1590_v48, %v1590_v48  ;;  %v1584_v43 = vsel %vm4934_vm7, %v1579_v38, %v1583_v24  ;;  %v1580_v44 = vrot.slane %v1579_v38, 4  ;;  %v5035_v45 = vld [vmem:[#allocation3 + $0x10] sm:$0xff]  ;;  %v4419_v24 = vld [vmem:[#allocation5 + $0x1f8] sm:$0xff]  ;;  %v1626_v48 = vld [vmem:[#allocation3 + $0x24] sm:$0xf] }
 0x159   : > { %1585 = vst [vmem:[#allocation3 + $0x18] sm:$0xe] %v1584_v43  ;;  %v1155_v53 = vpop.f32.mrf.mxu2  ;;  %v5037_v55 = vld [vmem:[#allocation3 + $0x10] sm:$0xff]  ;;  %v1912_v15 = vshll.u32 %v5035_v45, 16  ;;  %3184 = vmatpush.bf16.msra.mxu0 %v4419_v24  ;;  %vm2481_vm7 = vsmask.f32 6400 }
 0x15a   : > { %v1593_v3 = vshrl.u32 %v1591_v39, 16  ;;  %v1596_v54 = vshll.u32 %v1591_v39, 16  ;;  %v1309_v52 = vpop.f32.mrf.mxu3  ;;  %v1587_v49 = vsel %vm4941_vm8, %v1580_v44, %v1586_v1  ;;  %v4318_v56 = vld [vmem:[#allocation3 + $0x10] sm:$0xff]  ;;  %v2116_v9 = vrot.slane %v5037_v55, 1  ;;  %v1642_v44 = vld [vmem:[#allocation3 + $0x28] sm:$0xf] }
 0x15b   : > { %v1432_v13 = vpop.f32.mrf.mxu0  ;;  %1588 = vst [vmem:[#allocation3 + $0x1c] sm:$0x3] %v1587_v49  ;;  %v5048_v16 = vrot.slane %v1912_v15, 1  ;;  %v1645_v53 = vld [vmem:[#allocation3 + $0x2c] sm:$0x1]  ;;  %vm3304_vm8 = vcmask 1044480  }
 0x15c   : > { %v1595_v59 = vrot.slane %v1593_v3, 5  ;;  %v1598_v63 = vrot.slane %v1596_v54, 6  ;;  %v1444_v4 = vadd.f32 %v1432_v13, %v1319_v8  ;;  %v2117_v22 = vsel %vm1375_vm3, %v2114_v7, %v2116_v9  ;;  %v4403_v13 = vld [vmem:[#allocation5 + $0x1a0] sm:$0xff]  ;;  %v4417_v49 = vld [vmem:[#allocation5 + $0x1e8] sm:$0xff] }
 0x15d   : > { %v1609_v12 = vld [vmem:[#allocation2 + $0x36] sm:$0xff]  ;;  %v1915_v0 = vsel %vm532_vm2, %v1910_v27, %v5048_v16  ;;  %3185 = vmatpush.bf16.msra.mxu0 %v4418_v2  ;;  %2960 = vmatpush.bf16.msra.mxu3 %v4403_v13  ;;  %v4399_v27 = vld [vmem:[#allocation5 + $0x180] sm:$0xff] }
 0x15e   : > { %v1599_v6 = vor.u32 %v1598_v63, %v1595_v59  ;;  %v1610_v50 = vmax.f32 %v1609_v12, 0.0  ;;  %1453 = vst [vmem:[#allocation2 + $0x40] sm:$0xff] %v1444_v4  ;;  %v4432_v59 = vld [vmem:[#allocation5 + $0x238] sm:$0xff]  ;;  %v1916_v4 = vshrl.u32 %v5035_v45, 16 }
 0x15f   : > { %1794 = vmatmul.bf16.gmra.mxu1 %v4318_v56 }
 0x160   : > { %v1600_v11 = vrot.slane %v1599_v6, 4  ;;  %v1611_v41 = vpack.c.bf16 %v1610_v50, %v1610_v50  ;;  %v5043_v61 = vld [vmem:[#allocation3 + $0x14] sm:$0xff]  ;;  %v1604_v34 = vsel %vm4962_vm13, %v1599_v6, %v1603_v5  ;;  %v1918_v35 = vor.u32 %v1916_v4, %v5048_v16  ;;  %3369 = vmatpush.bf16.msra.mxu1 %v4432_v59  ;;  %v4389_v6 = vld [vmem:[#allocation5 + $0x158] sm:$0xff]  ;;  %v4416_v50 = vld [vmem:[#allocation5 + $0x1e0] sm:$0xff] }
 0x161   : > { %1605 = vst [vmem:[#allocation3 + $0x1c] sm:$0xc] %v1604_v34  ;;  %v2300_v46 = vrot.slane %v5043_v61, 1  ;;  %3186 = vmatpush.bf16.msra.mxu0 %v4417_v49  ;;  %2961 = vmatpush.bf16.msra.mxu3 %v4402_v51  ;;  %v4431_v34 = vld [vmem:[#allocation5 + $0x230] sm:$0xff]  ;;  %v4387_v61 = vld [vmem:[#allocation5 + $0x148] sm:$0xff] }
 0x162   : > { %v1613_v19 = vshll.u32 %v1611_v41, 16  ;;  %v1616_v20 = vshrl.u32 %v1611_v41, 16  ;;  %v1607_v33 = vsel %vm4967_vm14, %v1600_v11, %v1606_v10  ;;  %2777 = vmatpush.bf16.msra.mxu2 %v4389_v6  ;;  %v4415_v10 = vld [vmem:[#allocation5 + $0x1d8] sm:$0xff]  ;;  %v4388_v41 = vld [vmem:[#allocation5 + $0x150] sm:$0xff] }
 0x163   : > { %1608 = vst [vmem:[#allocation3 + $0x20] sm:$0x7] %v1607_v33  ;;  %2190 = vmatmul.bf16.gmra.mxu3 %v2117_v22  ;;  %v1434_v23 = vpop.f32.mrf.mxu0  ;;  %v2301_v25 = vsel %vm1375_vm3, %v2298_v58, %v2300_v46  ;;  %v4369_v33 = vld [vmem:[#allocation3 + $0xc] sm:$0xff]  ;;  %v4370_v59 = vld [vmem:[#allocation3 + $0x14] sm:$0xff] }
 0x164   : > { %v1615_v28 = vrot.slane %v1613_v19, 5  ;;  %v1618_v31 = vrot.slane %v1616_v20, 4  ;;  %3370 = vmatpush.bf16.msra.mxu1 %v4431_v34  ;;  %v4368_v20 = vld [vmem:[#allocation3 + $0x4] sm:$0xf0]  ;;  %v2494_v24 = vshll.u32 %v4369_v33, 16  ;;  %v2503_v6 = vshll.u32 %v4370_v59, 16 }
 0x165   : > { %v1629_v40 = vld [vmem:[#allocation2 + $0x3f] sm:$0xff]  ;;  %3187 = vmatpush.bf16.msra.mxu0 %v4416_v50  ;;  %v4386_v23 = vld [vmem:[#allocation5 + $0x140] sm:$0xff]  ;;  %v4407_v50 = vld [vmem:[#allocation3 + $0x8] sm:$0xf0] }
 0x166   : > { %v1619_v17 = vor.u32 %v1618_v31, %v1615_v28  ;;  %v1624_v37 = vsel %vm4977_vm1, %v1615_v28, %v1623_v57  ;;  %v1630_v7 = vmax.f32 %v1629_v40, 0.0  ;;  %2006 = vmatmul.bf16.gmra.mxu2 %v1915_v0  ;;  %2374 = vmatmul.bf16.gmra.mxu0 %v2301_v25  ;;  %v4012_v57 = vld [vmem:[#allocation3 + $0x4] sm:$0xe] }
 0x167   : > { %1625 = vst [vmem:[#allocation3 + $0x20] sm:$0x8] %v1624_v37  ;;  %2778 = vmatpush.bf16.msra.mxu2 %v4388_v41  ;;  %v4013_v40 = vor.u32 %v4368_v20, %v4012_v57  ;;  %v4394_v41 = vld [vmem:[#allocation3 + $0x8] sm:$0xf0]  ;;  %v4381_v20 = vld [vmem:[#allocation3 + $0x4] sm:$0xf0] }
 0x168   : > { %v1620_v36 = vrot.slane %v1619_v17, 4  ;;  %v1631_v38 = vpack.c.bf16 %v1630_v7, %v1630_v7  ;;  %v5068_v26 = vld [vmem:[#allocation3 + $0x18] sm:$0xff]  ;;  %v2491_v17 = vshrl.u32 %v4369_v33, 16  ;;  %v4382_v33 = vld [vmem:[#allocation3 + $0xc] sm:$0xff] }
 0x169   : > { %v5070_v39 = vld [vmem:[#allocation3 + $0x18] sm:$0xff]  ;;  %v1920_v1 = vshll.u32 %v5068_v26, 16  ;;  %3188 = vmatpush.bf16.msra.mxu0 %v4415_v10  ;;  %v1924_v28 = vshrl.u32 %v5068_v26, 16  ;;  %v2483_v26 = vshrl.u32 %v4013_v40, 16  ;;  %v2486_v32 = vshll.u32 %v4013_v40, 16  ;;  %v4408_v10 = vld [vmem:[#allocation3 + $0x10] sm:$0xff] }
 0x16a   : > { %v1633_v62 = vshrl.u32 %v1631_v38, 16  ;;  %v1627_v43 = vsel %vm4988_vm6, %v1620_v36, %v1626_v48  ;;  %v1636_v58 = vshll.u32 %v1631_v38, 16  ;;  %v4319_v54 = vld [vmem:[#allocation3 + $0x18] sm:$0xff]  ;;  %v2118_v8 = vrot.slane %v5070_v39, 1  ;;  %v4412_v36 = vld [vmem:[#allocation5 + $0x1c0] sm:$0xff]  ;;  %v4430_v38 = vld [vmem:[#allocation5 + $0x228] sm:$0xff] }
 0x16b   : > { %1628 = vst [vmem:[#allocation3 + $0x24] sm:$0xf] %v1627_v43  ;;  %v1922_v12 = vrot.slane %v1920_v1, 1  ;;  %2779 = vmatpush.bf16.msra.mxu2 %v4387_v61  ;;  %3371 = vmatpush.bf16.msra.mxu1 %v4430_v38  ;;  %v2493_v39 = vrot.slane %v2491_v17, 1  ;;  %v2496_v43 = vrot.slane %v2494_v24, 2  ;;  %v2488_v1 = vrot.slane %v2486_v32, 2 }
 0x16c   : > { %v1635_v42 = vrot.slane %v1633_v62, 7  ;;  %v2119_v15 = vsel %vm1375_vm3, %v2116_v9, %v2118_v8  ;;  %v4401_v9 = vld [vmem:[#allocation5 + $0x190] sm:$0xff]  ;;  %v4116_v61 = vld [vmem:[#allocation3 + $0x8] sm:$0xc] }
 0x16d   : > { %v1923_v56 = vsel %vm532_vm2, %v1918_v35, %v1922_v12  ;;  %2962 = vmatpush.bf16.msra.mxu3 %v4401_v9  ;;  %3189 = vmatpush.bf16.msra.mxu0 %v4414_v60  ;;  %v1926_v7 = vor.u32 %v1924_v28, %v1922_v12  ;;  %v2505_v9 = vrot.slane %v2503_v6, 2 }
 0x16e   : > { %v1638_v47 = vor.u32 %v1636_v58, %v1635_v42  ;;  %v1639_v3 = vrot.slane %v1635_v42, 4  ;;  %v5076_v52 = vld [vmem:[#allocation3 + $0x1c] sm:$0xff]  ;;  %v4429_v58 = vld [vmem:[#allocation5 + $0x220] sm:$0xff] }
 0x16f   : > { %1799 = vmatmul.bf16.gmra.mxu1 %v4319_v54  ;;  %v2302_v5 = vrot.slane %v5076_v52, 1  ;;  %2780 = vmatpush.bf16.msra.mxu2 %v4386_v23 }
 0x170   : > { %v1643_v29 = vsel %vm4997_vm12, %v1638_v47, %v1642_v44  ;;  %v1646_v63 = vsel %vm5004_vm15, %v1639_v3, %v1645_v53  ;;  %v2485_v44 = vrot.slane %v2483_v26, 1  ;;  %3372 = vmatpush.bf16.msra.mxu1 %v4429_v58  ;;  %v2497_v3 = vor.u32 %v2496_v43, %v2493_v39  ;;  %v4409_v43 = vld [vmem:[#allocation3 + $0x18] sm:$0xff] }
 0x171   : > { %1644 = vst [vmem:[#allocation3 + $0x28] sm:$0xf] %v1643_v29  ;;  %v2303_v45 = vsel %vm1375_vm3, %v2300_v46, %v2302_v5  ;;  %2963 = vmatpush.bf16.msra.mxu3 %v4400_v14  ;;  %v4413_v46 = vld [vmem:[#allocation5 + $0x1c8] sm:$0xff]  ;;  %v4396_v58 = vld [vmem:[#allocation3 + $0x18] sm:$0xff] }
 0x172   : > { %1647 = vst [vmem:[#allocation3 + $0x2c] sm:$0x1] %v1646_v63  ;;  %v5094_v55 = vld [vmem:[#allocation3 + $0x20] sm:$0xff]  ;;  %3190 = vmatpush.bf16.msra.mxu0 %v4413_v46  ;;  %v4395_v14 = vld [vmem:[#allocation3 + $0x10] sm:$0xff] }
 0x173   : > { %2195 = vmatmul.bf16.gmra.mxu3 %v2119_v15  ;;  %v5096_v11 = vld [vmem:[#allocation3 + $0x20] sm:$0xff]  ;;  %v1928_v18 = vshll.u32 %v5094_v55, 16  ;;  %v1932_v63 = vshrl.u32 %v5094_v55, 16 }
 0x174   : > { %v4320_v16 = vld [vmem:[#allocation3 + $0x20] sm:$0xff]  ;;  %v2120_v19 = vrot.slane %v5096_v11, 1  ;;  %v4168_v11 = vld [vmem:[#allocation3 + $0x8] sm:$0xc] }
 0x175   : > { %v1930_v31 = vrot.slane %v1928_v18, 1  ;;  %2964 = vmatpush.bf16.msra.mxu3 %v4399_v27  ;;  %v4428_v55 = vld [vmem:[#allocation5 + $0x218] sm:$0xff]  ;;  %v4169_v34 = vor.u32 %v4407_v50, %v4168_v11  ;;  %v3087_v18 = vshrl.u32 %v4408_v10, 16  ;;  %v2894_v27 = vrot.slane %v4395_v14, 2  ;;  %v4064_v46 = vld [vmem:[#allocation3 + $0x4] sm:$0xc] }
 0x176   : > { %2011 = vmatmul.bf16.gmra.mxu2 %v1923_v56  ;;  %2379 = vmatmul.bf16.gmra.mxu0 %v2303_v45  ;;  %v2121_v0 = vsel %vm1375_vm3, %v2118_v8, %v2120_v19  ;;  %v2489_v8 = vor.u32 %v2488_v1, %v2485_v44  ;;  %v4065_v28 = vor.u32 %v4381_v20, %v4064_v46  ;;  %v3096_v1 = vshrl.u32 %v4409_v43, 16 }
 0x177   : > { %v1931_v48 = vsel %vm532_vm2, %v1926_v7, %v1930_v31  ;;  %3191 = vmatpush.bf16.msra.mxu0 %v4412_v36  ;;  %v1934_v15 = vor.u32 %v1932_v63, %v1930_v31  ;;  %3373 = vmatpush.bf16.msra.mxu1 %v4428_v55  ;;  %v3082_v57 = vshll.u32 %v4169_v34, 16  ;;  %v3089_v31 = vrot.slane %v3087_v18, 2 }
 0x178   : > { %v5100_v22 = vld [vmem:[#allocation3 + $0x24] sm:$0xff]  ;;  %v2498_v52 = vsel %vm2481_vm7, %v2489_v8, %v2497_v3  ;;  %v2710_v7 = vrot.slane %v4382_v33, 2  ;;  %v2709_v36 = vrot.slane %v4065_v28, 2  ;;  %v3098_v8 = vrot.slane %v3096_v1, 2  ;;  %v4420_v1 = vld [vmem:[#allocation3 + $0x8] sm:$0xf0] }
 0x179   : > { %v1850_v37 = vld [vmem:[#allocation3 + $0x28] sm:$0x1]  ;;  %v2304_v30 = vrot.slane %v5100_v22, 1  ;;  %v2251_v42 = vld [vmem:[#allocation3 + $0x2c] sm:$0x1]  ;;  %v3079_v22 = vshrl.u32 %v4169_v34, 16 }
 0x17a   : > { %v2067_v25 = vld [vmem:[#allocation3 + $0x28] sm:$0x1]  ;;  %v1889_v21 = vunpack.c.l.b16 %v1850_v37  ;;  %v2290_v54 = vunpack.c.l.b16 %v2251_v42  ;;  %v4427_v37 = vld [vmem:[#allocation5 + $0x210] sm:$0xff]  ;;  %v3084_v24 = vrot.slane %v3082_v57, 3  ;;  %v4426_v42 = vld [vmem:[#allocation5 + $0x208] sm:$0xff] }
 0x17b   : > { %v2106_v2 = vunpack.c.l.b16 %v2067_v25  ;;  %v2305_v62 = vsel %vm1375_vm3, %v2302_v5, %v2304_v30  ;;  %v2500_v5 = vshrl.u32 %v4370_v59, 16  ;;  %3374 = vmatpush.bf16.msra.mxu1 %v4427_v37  ;;  %v2435_v50 = vld [vmem:[#allocation3 + $0x2c] sm:$0x3] }
 0x17c   : > { %v1895_v53 = vpack.c.b16 %v1889_v21, %v1889_v21  ;;  %v2296_v49 = vpack.c.b16 %v2290_v54, %v2290_v54  ;;  %v2474_v55 = vunpack.c.l.b16 %v2435_v50 }
 0x17d   : > { %v2112_v47 = vpack.c.b16 %v2106_v2, %v2106_v2  ;;  %v2502_v45 = vrot.slane %v2500_v5, 1 }
 0x17e   : > { %v1936_v29 = vshll.u32 %v1895_v53, 16  ;;  %v2306_v35 = vrot.slane %v2296_v49, 1  ;;  %v3099_v53 = vshll.u32 %v4409_v43, 16  ;;  %v2480_v18 = vpack.c.b16 %v2474_v55, %v2474_v55 }
 0x17f   : > { %1804 = vmatmul.bf16.gmra.mxu1 %v4320_v16  ;;  %v2122_v13 = vrot.slane %v2112_v47, 1  ;;  %v2506_v60 = vor.u32 %v2505_v9, %v2502_v45  ;;  %v3090_v16 = vshll.u32 %v4408_v10, 16  ;;  %v4383_v47 = vld [vmem:[#allocation3 + $0x14] sm:$0xff] }
 0x180   : > { %v1938_v4 = vrot.slane %v1936_v29, 1  ;;  %v2307_v56 = vsel %vm1375_vm3, %v2304_v30, %v2306_v35  ;;  %v3081_v30 = vrot.slane %v3079_v22, 2  ;;  %3375 = vmatpush.bf16.msra.mxu1 %v4426_v42  ;;  %v3101_v29 = vrot.slane %v3099_v53, 3 }
 0x181   : > { %v2123_v12 = vsel %vm1375_vm3, %v2120_v19, %v2122_v13  ;;  %v4117_v19 = vor.u32 %v4394_v41, %v4116_v61  ;;  %v2507_v23 = vsel %vm2481_vm7, %v2497_v3, %v2506_v60  ;;  %v3092_v40 = vrot.slane %v3090_v16, 3  ;;  %v4372_v13 = vld [vmem:[#allocation3 + $0x24] sm:$0xff]  ;;  %v4384_v41 = vld [vmem:[#allocation3 + $0x1c] sm:$0xff] }
 0x182   : > { %v1939_v51 = vsel %vm532_vm2, %v1934_v15, %v1938_v4  ;;  %vm2708_vm2 = vcmask 1045504   ;;  %vm3077_vm3 = vsmask.f32 5376  ;;  %v3085_v21 = vor.u32 %v3084_v24, %v3081_v30  ;;  %v4425_v15 = vld [vmem:[#allocation5 + $0x200] sm:$0xff] }
 0x183   : > { %2200 = vmatmul.bf16.gmra.mxu3 %v2121_v0  ;;  %v4371_v0 = vld [vmem:[#allocation3 + $0x1c] sm:$0xff]  ;;  %v2893_v17 = vrot.slane %v4117_v19, 2  ;;  %v3093_v38 = vor.u32 %v3092_v40, %v3089_v31  ;;  %v2711_v32 = vsel %vm2708_vm2, %v2709_v36, %v2710_v7  ;;  %v2896_v3 = vrot.slane %v4396_v58, 2  ;;  %v4411_v31 = vld [vmem:[#allocation3 + $0x28] sm:$0xff] }
 0x184   : > { %v2512_v26 = vshll.u32 %v4371_v0, 16  ;;  %v3102_v59 = vor.u32 %v3101_v29, %v3098_v8  ;;  %v2518_v63 = vshrl.u32 %v4372_v13, 16  ;;  %v2521_v4 = vshll.u32 %v4372_v13, 16  ;;  %3376 = vmatpush.bf16.msra.mxu1 %v4425_v15  ;;  %v4398_v40 = vld [vmem:[#allocation3 + $0x28] sm:$0xff] }
 0x185   : > { %v2895_v25 = vsel %vm2708_vm2, %v2893_v17, %v2894_v27  ;;  %v3094_v2 = vsel %vm3077_vm3, %v3085_v21, %v3093_v38  ;;  %v2897_v49 = vsel %vm2708_vm2, %v2894_v27, %v2896_v3  ;;  %v2714_v16 = vrot.slane %v4384_v41, 2  ;;  %v4385_v30 = vld [vmem:[#allocation3 + $0x24] sm:$0xff] }
 0x186   : > { %2016 = vmatmul.bf16.gmra.mxu2 %v1931_v48  ;;  %2384 = vmatmul.bf16.gmra.mxu0 %v2305_v62  ;;  %v2509_v48 = vshrl.u32 %v4371_v0, 16  ;;  %v2514_v39 = vrot.slane %v2512_v26, 2  ;;  %v3103_v35 = vsel %vm3077_vm3, %v3093_v38, %v3102_v59  ;;  %v2520_v5 = vrot.slane %v2518_v63, 1  ;;  %v4220_v13 = vld [vmem:[#allocation3 + $0x8] sm:$0x8] }
 0x187   : > { %v2523_v6 = vrot.slane %v2521_v4, 2  ;;  %v2527_v33 = vshrl.u32 %v2480_v18, 16  ;;  %v2530_v22 = vshll.u32 %v2480_v18, 16  ;;  %v3114_v17 = vshrl.u32 %v4411_v31, 16 }
 0x188   : > { %v2511_v62 = vrot.slane %v2509_v48, 1  ;;  %v3117_v37 = vshll.u32 %v4411_v31, 16  ;;  %v2900_v24 = vrot.slane %v4398_v40, 2  ;;  %v3031_v48 = vld [vmem:[#allocation3 + $0x30] sm:$0x7]  ;;  %v2716_v26 = vrot.slane %v4385_v30, 2 }
 0x189   : > { %v2524_v9 = vor.u32 %v2523_v6, %v2520_v5  ;;  %v2532_v28 = vrot.slane %v2530_v22, 2  ;;  %v3116_v36 = vrot.slane %v3114_v17, 2 }
 0x18a   : > { %v2515_v44 = vor.u32 %v2514_v39, %v2511_v62  ;;  %v3119_v38 = vrot.slane %v3117_v37, 3  ;;  %v3070_v62 = vunpack.c.l.b16 %v3031_v48  ;;  %v5133_v39 = vld [vmem:[%s5228_s4] ss:$0 sm:$0xff]  ;;  %v2717_v58 = vsel %vm2708_vm2, %v2714_v16, %v2716_v26 }
 0x18c   : > { %v2516_v54 = vsel %vm2481_vm7, %v2506_v60, %v2515_v44  ;;  %v2525_v14 = vsel %vm2481_vm7, %v2515_v44, %v2524_v9  ;;  %v3120_v21 = vor.u32 %v3119_v38, %v3116_v36  ;;  %v3076_v8 = vpack.c.b16 %v3070_v62, %v3070_v62 }
 0x18e   : > { %v3123_v15 = vshrl.u32 %v3076_v8, 16 }
 0x18f   : > { %2596 = vmatmul.bf16.vlgmr.msrb.gmra.mxu1 %v2498_v52  ;;  %v2712_v52 = vrot.slane %v4383_v47, 2  ;;  %v2662_v47 = vld [vmem:[#allocation3 + $0x2c] sm:$0x3] }
 0x190   : > { %v3125_v55 = vrot.slane %v3123_v15, 2 }
 0x191   : > { %v2715_v27 = vsel %vm2708_vm2, %v2712_v52, %v2714_v16 }
 0x193   : > { %2205 = vmatmul.bf16.gmra.mxu3 %v2123_v12  ;;  %v2713_v12 = vsel %vm2708_vm2, %v2710_v7, %v2712_v52 }
 0x196   : > { %2021 = vmatmul.bf16.gmra.mxu2 %v1939_v51  ;;  %2389 = vmatmul.bf16.gmra.mxu0 %v2307_v56  ;;  %v4410_v51 = vld [vmem:[#allocation3 + $0x20] sm:$0xff] }
 0x197   : > { %v4397_v56 = vld [vmem:[#allocation3 + $0x20] sm:$0xff]  ;;  %v3105_v10 = vshrl.u32 %v4410_v51, 16  ;;  %v3108_v11 = vshll.u32 %v4410_v51, 16 }
 0x198   : > { %v2898_v34 = vrot.slane %v4397_v56, 2 }
 0x199   : > { %v3107_v60 = vrot.slane %v3105_v10, 2  ;;  %v3110_v61 = vrot.slane %v3108_v11, 3 }
 0x19a   : > { %v2899_v19 = vsel %vm2708_vm2, %v2896_v3, %v2898_v34 }
 0x19b   : > { %v3111_v20 = vor.u32 %v3110_v61, %v3107_v60 }
 0x19d   : > { %v3112_v46 = vsel %vm3077_vm3, %v3102_v59, %v3111_v20  ;;  %v3121_v3 = vsel %vm3077_vm3, %v3111_v20, %v3120_v21  ;;  %v2701_v59 = vunpack.c.l.b16 %v2662_v47 }
 0x19f   : > { %2601 = vmatmul.bf16.gmra.mxu1 %v2507_v23  ;;  %v2529_v23 = vrot.slane %v2527_v33, 1  ;;  %v2707_v56 = vpack.c.b16 %v2701_v59, %v2701_v59 }
 0x1a1   : > { %v2533_v0 = vor.u32 %v2532_v28, %v2529_v23  ;;  %v2718_v60 = vrot.slane %v2707_v56, 2 }
 0x1a3   : > { %2965 = vmatmul.bf16.vlgmr.msra.gmra.mxu3 %v2895_v25  ;;  %v2534_v25 = vsel %vm2481_vm7, %v2524_v9, %v2533_v0  ;;  %v2719_v22 = vsel %vm2708_vm2, %v2716_v26, %v2718_v60 }
 0x1a6   : > { %2781 = vmatmul.bf16.vlgmr.msra.gmra.mxu2 %v2711_v32  ;;  %3192 = vmatmul.bf16.vlgmr.msra.gmra.mxu0 %v3094_v2  ;;  %v2901_v32 = vsel %vm2708_vm2, %v2898_v34, %v2900_v24  ;;  %v2847_v2 = vld [vmem:[#allocation3 + $0x30] sm:$0x3] }
 0x1a7   : > { %v2886_v53 = vunpack.c.l.b16 %v2847_v2 }
 0x1a9   : > { %v2892_v4 = vpack.c.b16 %v2886_v53, %v2886_v53 }
 0x1ab   : > { %v2902_v10 = vrot.slane %v2892_v4, 2 }
 0x1ad   : > { %v2903_v18 = vsel %vm2708_vm2, %v2900_v24, %v2902_v10 }
 0x1ae   : > { %v1785_v45 = vpop.f32.mrf.mxu1 }
 0x1af   : > { %2606 = vmatmul.bf16.gmra.mxu1 %v2516_v54  ;;  %v4421_v54 = vld [vmem:[#allocation3 + $0x10] sm:$0xff]  ;;  %v1810_v29 = vadd.f32 %v5133_v39, %v1785_v45 }
 0x1b3   : > { %2970 = vmatmul.bf16.gmra.mxu3 %v2897_v49  ;;  %v4221_v49 = vor.u32 %v4420_v1, %v4220_v13 }
 0x1b5   : > { %v3305_v50 = vrot.slane %v4221_v49, 3 }
 0x1b6   : > { %2786 = vmatmul.bf16.gmra.mxu2 %v2713_v12  ;;  %3197 = vmatmul.bf16.gmra.mxu0 %v3103_v35  ;;  %v1787_v57 = vpop.f32.mrf.mxu1  ;;  %v3306_v12 = vrot.slane %v4421_v54, 3  ;;  %v3126_v35 = vshll.u32 %v3076_v8, 16 }
 0x1b7   : > { %v1811_v34 = vadd.f32 %v5133_v39, %v1787_v57  ;;  %v4422_v57 = vld [vmem:[#allocation3 + $0x18] sm:$0xff] }
 0x1b8   : > { %v3307_v45 = vsel %vm3304_vm8, %v3305_v50, %v3306_v12  ;;  %v3128_v41 = vrot.slane %v3126_v35, 3  ;;  %v3308_v0 = vrot.slane %v4422_v57, 3  ;;  %v4424_v35 = vld [vmem:[#allocation3 + $0x28] sm:$0xff] }
 0x1b9   : > { %v3312_v50 = vrot.slane %v4424_v35, 3 }
 0x1ba   : > { %v3129_v16 = vor.u32 %v3128_v41, %v3125_v55  ;;  %v3309_v36 = vsel %vm3304_vm8, %v3306_v12, %v3308_v0 }
 0x1bc   : > { %v3130_v23 = vsel %vm3077_vm3, %v3120_v21, %v3129_v16 }
 0x1bf   : > { %2611 = vmatmul.bf16.gmra.mxu1 %v2525_v14 }
 0x1c3   : > { %2975 = vmatmul.bf16.gmra.mxu3 %v2899_v19 }
 0x1c6   : > { %2791 = vmatmul.bf16.gmra.mxu2 %v2715_v27  ;;  %3202 = vmatmul.bf16.gmra.mxu0 %v3112_v46 }
 0x1cc   : > { %v5126_v7 = vpop.f32.mrf.mxu1 }
 0x1cd   : > { %v1812_v28 = vadd.f32 %v5133_v39, %v5126_v7 }
 0x1cf   : > { %2616 = vmatmul.bf16.gmra.mxu1 %v2534_v25 }
 0x1d3   : > { %2980 = vmatmul.bf16.gmra.mxu3 %v2901_v32  ;;  %v2370_v43 = vpop.f32.mrf.mxu0 }
 0x1d4   : > { %v1792_v42 = vpop.f32.mrf.mxu1 }
 0x1d5   : > { %v1813_v38 = vadd.f32 %v5133_v39, %v1792_v42 }
 0x1d6   : > { %2796 = vmatmul.bf16.gmra.mxu2 %v2717_v58  ;;  %v2186_v44 = vpop.f32.mrf.mxu3  ;;  %3207 = vmatmul.bf16.gmra.mxu0 %v3121_v3 }
 0x1d9   : > { %v2002_v52 = vpop.f32.mrf.mxu2 }
 0x1da   : > { %v2027_v63 = vadd.f32 %v2002_v52, %v1810_v29 }
 0x1db   : > { %v2372_v6 = vpop.f32.mrf.mxu0 }
 0x1dc   : > { %v2211_v5 = vadd.f32 %v2186_v44, %v2027_v63  ;;  %v1795_v51 = vpop.f32.mrf.mxu1 }
 0x1dd   : > { %v1814_v58 = vadd.f32 %v5133_v39, %v1795_v51 }
 0x1de   : > { %v2188_v9 = vpop.f32.mrf.mxu3  ;;  %v5138_v11 = vadd.f32 %v2370_v43, %v2211_v5  ;;  %v4423_v43 = vld [vmem:[#allocation3 + $0x20] sm:$0xff] }
 0x1df   : > { %3377 = vmatmul.bf16.vlgmr.msra.gmra.mxu1 %v3307_v45  ;;  %v3310_v53 = vrot.slane %v4423_v43, 3 }
 0x1e1   : > { %v2004_v14 = vpop.f32.mrf.mxu2  ;;  %v3311_v29 = vsel %vm3304_vm8, %v3308_v0, %v3310_v53  ;;  %v3313_v41 = vsel %vm3304_vm8, %v3310_v53, %v3312_v50 }
 0x1e2   : > { %v2028_v61 = vadd.f32 %v2004_v14, %v1811_v34  ;;  %v3258_v14 = vld [vmem:[#allocation3 + $0x30] sm:$0x7] }
 0x1e3   : > { %2985 = vmatmul.bf16.gmra.mxu3 %v2903_v18  ;;  %v2375_v20 = vpop.f32.mrf.mxu0  ;;  %v3297_v16 = vunpack.c.l.b16 %v3258_v14 }
 0x1e4   : > { %v2212_v19 = vadd.f32 %v2188_v9, %v2028_v61  ;;  %v1797_v33 = vpop.f32.mrf.mxu1 }
 0x1e5   : > { %v1815_v13 = vadd.f32 %v5133_v39, %v1797_v33 }
 0x1e6   : > { %2801 = vmatmul.bf16.gmra.mxu2 %v2719_v22  ;;  %v2191_v27 = vpop.f32.mrf.mxu3  ;;  %v5144_v46 = vadd.f32 %v2372_v6, %v2212_v19  ;;  %3212 = vmatmul.bf16.gmra.mxu0 %v3130_v23 }
 0x1e9   : > { %v2007_v31 = vpop.f32.mrf.mxu2 }
 0x1ea   : > { %v2029_v40 = vadd.f32 %v2007_v31, %v1812_v28 }
 0x1eb   : > { %v2377_v37 = vpop.f32.mrf.mxu0 }
 0x1ec   : > { %v2213_v17 = vadd.f32 %v2191_v27, %v2029_v40  ;;  %v1800_v30 = vpop.f32.mrf.mxu1  ;;  %v3303_v27 = vpack.c.b16 %v3297_v16, %v3297_v16 }
 0x1ed   : > { %v1816_v5 = vadd.f32 %v5133_v39, %v1800_v30 }
 0x1ee   : > { %v2193_v24 = vpop.f32.mrf.mxu3  ;;  %v2397_v25 = vadd.f32 %v2375_v20, %v2213_v17  ;;  %v3314_v40 = vrot.slane %v3303_v27, 3 }
 0x1ef   : > { %3382 = vmatmul.bf16.gmra.mxu1 %v3309_v36 }
 0x1f1   : > { %v2009_v48 = vpop.f32.mrf.mxu2 }
 0x1f2   : > { %v2030_v26 = vadd.f32 %v2009_v48, %v1813_v38 }
 0x1f3   : > { %v2380_v21 = vpop.f32.mrf.mxu0 }
 0x1f4   : > { %v2214_v32 = vadd.f32 %v2193_v24, %v2030_v26  ;;  %v1802_v2 = vpop.f32.mrf.mxu1  ;;  %v3315_v24 = vsel %vm3304_vm8, %v3312_v50, %v3314_v40 }
 0x1f5   : > { %v1817_v34 = vadd.f32 %v5133_v39, %v1802_v2 }
 0x1f6   : > { %v2196_v7 = vpop.f32.mrf.mxu3  ;;  %v5151_v62 = vadd.f32 %v2377_v37, %v2214_v32 }
 0x1f9   : > { %v2012_v44 = vpop.f32.mrf.mxu2 }
 0x1fa   : > { %v2031_v1 = vadd.f32 %v2012_v44, %v1814_v58 }
 0x1fb   : > { %v2382_v3 = vpop.f32.mrf.mxu0 }
 0x1fc   : > { %v2215_v47 = vadd.f32 %v2196_v7, %v2031_v1  ;;  %v1805_v54 = vpop.f32.mrf.mxu1 }
 0x1fe   : > { %v2198_v8 = vpop.f32.mrf.mxu3  ;;  %v2399_v42 = vadd.f32 %v2380_v21, %v2215_v47 }
 0x1ff   : > { %3387 = vmatmul.bf16.gmra.mxu1 %v3311_v29 }
 0x201   : > { %v2014_v52 = vpop.f32.mrf.mxu2 }
 0x202   : > { %v2032_v49 = vadd.f32 %v2014_v52, %v1815_v13 }
 0x203   : > { %v2385_v15 = vpop.f32.mrf.mxu0 }
 0x204   : > { %v2216_v59 = vadd.f32 %v2198_v8, %v2032_v49  ;;  %v1807_v63 = vpop.f32.mrf.mxu1 }
 0x205   : > { %v1819_v36 = vadd.f32 %v5133_v39, %v1807_v63 }
 0x206   : > { %v2201_v4 = vpop.f32.mrf.mxu3  ;;  %v2400_v12 = vadd.f32 %v2382_v3, %v2216_v59 }
 0x209   : > { %v2017_v6 = vpop.f32.mrf.mxu2 }
 0x20a   : > { %v2033_v51 = vadd.f32 %v2017_v6, %v1816_v5 }
 0x20b   : > { %v2387_v60 = vpop.f32.mrf.mxu0 }
 0x20c   : > { %v2217_v56 = vadd.f32 %v2201_v4, %v2033_v51  ;;  %v2597_v9 = vpop.f32.mrf.mxu1 }
 0x20d   : > { %v2622_v10 = vadd.f32 %v2597_v9, %v5138_v11  ;;  %v1818_v11 = vadd.f32 %v5133_v39, %v1805_v54 }
 0x20e   : > { %v2401_v45 = vadd.f32 %v2385_v15, %v2217_v56  ;;  %v2203_v55 = vpop.f32.mrf.mxu3 }
 0x20f   : > { %3392 = vmatmul.bf16.gmra.mxu1 %v3313_v41 }
 0x211   : > { %v2019_v61 = vpop.f32.mrf.mxu2 }
 0x212   : > { %v2034_v18 = vadd.f32 %v2019_v61, %v1817_v34 }
 0x213   : > { %v2390_v31 = vpop.f32.mrf.mxu0 }
 0x214   : > { %v2218_v19 = vadd.f32 %v2203_v55, %v2034_v18  ;;  %v2599_v20 = vpop.f32.mrf.mxu1 }
 0x215   : > { %v2623_v33 = vadd.f32 %v2599_v20, %v5144_v46 }
 0x216   : > { %v2402_v22 = vadd.f32 %v2387_v60, %v2218_v19  ;;  %v2206_v23 = vpop.f32.mrf.mxu3 }
 0x219   : > { %v2022_v57 = vpop.f32.mrf.mxu2 }
 0x21a   : > { %v2035_v28 = vadd.f32 %v2022_v57, %v1818_v11 }
 0x21b   : > { %v2392_v32 = vpop.f32.mrf.mxu0 }
 0x21c   : > { %v2219_v0 = vadd.f32 %v2206_v23, %v2035_v28  ;;  %v2602_v17 = vpop.f32.mrf.mxu1 }
 0x21d   : > { %v2624_v37 = vadd.f32 %v2602_v17, %v2397_v25 }
 0x21e   : > { %v2403_v30 = vadd.f32 %v2390_v31, %v2219_v0  ;;  %v2208_v48 = vpop.f32.mrf.mxu3 }
 0x21f   : > { %3397 = vmatmul.bf16.gmra.mxu1 %v3315_v24 }
 0x221   : > { %v2024_v38 = vpop.f32.mrf.mxu2 }
 0x222   : > { %v2036_v46 = vadd.f32 %v2024_v38, %v1819_v36 }
 0x223   : > { %v3193_v8 = vpop.f32.mrf.mxu0 }
 0x224   : > { %v2220_v26 = vadd.f32 %v2208_v48, %v2036_v46  ;;  %v2604_v21 = vpop.f32.mrf.mxu1 }
 0x225   : > { %v2625_v2 = vadd.f32 %v2604_v21, %v5151_v62 }
 0x226   : > { %v2404_v7 = vadd.f32 %v2392_v32, %v2220_v26  ;;  %v2966_v39 = vpop.f32.mrf.mxu3 }
 0x229   : > { %v2782_v47 = vpop.f32.mrf.mxu2 }
 0x22a   : > { %v2807_v59 = vadd.f32 %v2782_v47, %v2622_v10 }
 0x22b   : > { %v3195_v49 = vpop.f32.mrf.mxu0 }
 0x22c   : > { %v2607_v43 = vpop.f32.mrf.mxu1 }
 0x22d   : > { %v2626_v58 = vadd.f32 %v2607_v43, %v2399_v42 }
 0x22e   : > { %v2968_v62 = vpop.f32.mrf.mxu3 }
 0x231   : > { %v2784_v29 = vpop.f32.mrf.mxu2 }
 0x232   : > { %v2808_v35 = vadd.f32 %v2784_v29, %v2623_v33 }
 0x233   : > { %v3198_v5 = vpop.f32.mrf.mxu0 }
 0x234   : > { %v2609_v44 = vpop.f32.mrf.mxu1  ;;  %v2992_v9 = vadd.f32 %v2968_v62, %v2808_v35 }
 0x235   : > { %v2627_v1 = vadd.f32 %v2609_v44, %v2400_v12  ;;  %v2991_v12 = vadd.f32 %v2966_v39, %v2807_v59 }
 0x236   : > { %v2971_v15 = vpop.f32.mrf.mxu3  ;;  %v3219_v55 = vadd.f32 %v3195_v49, %v2992_v9 }
 0x237   : > { %v3218_v6 = vadd.f32 %v3193_v8, %v2991_v12 }
 0x239   : > { %v2787_v42 = vpop.f32.mrf.mxu2 }
 0x23b   : > { %v3200_v34 = vpop.f32.mrf.mxu0 }
 0x23c   : > { %v2612_v25 = vpop.f32.mrf.mxu1 }
 0x23d   : > { %v5165_v53 = vadd.f32 %v2612_v25, %v2401_v45  ;;  %v2809_v45 = vadd.f32 %v2787_v42, %v2624_v37 }
 0x23e   : > { %v2973_v10 = vpop.f32.mrf.mxu3 }
 0x23f   : > { %v2993_v61 = vadd.f32 %v2971_v15, %v2809_v45 }
 0x241   : > { %v2789_v51 = vpop.f32.mrf.mxu2  ;;  %v3220_v16 = vadd.f32 %v3198_v5, %v2993_v61 }
 0x242   : > { %v2810_v18 = vadd.f32 %v2789_v51, %v2625_v2 }
 0x243   : > { %v3203_v27 = vpop.f32.mrf.mxu0 }
 0x244   : > { %v2614_v3 = vpop.f32.mrf.mxu1 }
 0x245   : > { %v5167_v54 = vadd.f32 %v2614_v3, %v2402_v22  ;;  %v2994_v22 = vadd.f32 %v2973_v10, %v2810_v18 }
 0x246   : > { %v2976_v19 = vpop.f32.mrf.mxu3 }
 0x247   : > { %v3221_v57 = vadd.f32 %v3200_v34, %v2994_v22 }
 0x249   : > { %v2792_v60 = vpop.f32.mrf.mxu2 }
 0x24a   : > { %v2811_v23 = vadd.f32 %v2792_v60, %v2626_v58 }
 0x24b   : > { %v3205_v37 = vpop.f32.mrf.mxu0 }
 0x24c   : > { %v2617_v13 = vpop.f32.mrf.mxu1  ;;  %v2995_v17 = vadd.f32 %v2976_v19, %v2811_v23 }
 0x24d   : > { %v5169_v52 = vadd.f32 %v2617_v13, %v2403_v30 }
 0x24e   : > { %v2978_v40 = vpop.f32.mrf.mxu3  ;;  %v3222_v36 = vadd.f32 %v3203_v27, %v2995_v17 }
 0x251   : > { %v2794_v11 = vpop.f32.mrf.mxu2 }
 0x252   : > { %v2812_v24 = vadd.f32 %v2794_v11, %v2627_v1 }
 0x253   : > { %v3208_v21 = vpop.f32.mrf.mxu0 }
 0x254   : > { %v2619_v63 = vpop.f32.mrf.mxu1  ;;  %v2996_v48 = vadd.f32 %v2978_v40, %v2812_v24 }
 0x255   : > { %v5171_v4 = vadd.f32 %v2619_v63, %v2404_v7 }
 0x256   : > { %v2981_v32 = vpop.f32.mrf.mxu3  ;;  %v3223_v7 = vadd.f32 %v3205_v37, %v2996_v48 }
 0x259   : > { %v2797_v30 = vpop.f32.mrf.mxu2 }
 0x25a   : > { %v2813_v2 = vadd.f32 %v2797_v30, %v5165_v53 }
 0x25b   : > { %v3210_v13 = vpop.f32.mrf.mxu0 }
 0x25c   : > { %v3378_v50 = vpop.f32.mrf.mxu1  ;;  %v2997_v47 = vadd.f32 %v2981_v32, %v2813_v2 }
 0x25d   : > { %v3403_v56 = vadd.f32 %v3378_v50, %v3218_v6 }
 0x25e   : > { %v2983_v1 = vpop.f32.mrf.mxu3  ;;  %v3224_v3 = vadd.f32 %v3208_v21, %v2997_v47 }
 0x25f   : > { %3424 = vst [vmem:[%s5176_s9] sm:$0xff] %v3403_v56 }
 0x261   : > { %v2799_v43 = vpop.f32.mrf.mxu2 }
 0x262   : > { %v2814_v39 = vadd.f32 %v2799_v43, %v5167_v54 }
 0x263   : > { %v3213_v35 = vpop.f32.mrf.mxu0 }
 0x264   : > { %v3380_v41 = vpop.f32.mrf.mxu1  ;;  %v2998_v49 = vadd.f32 %v2983_v1, %v2814_v39 }
 0x265   : > { %v3404_v14 = vadd.f32 %v3380_v41, %v3219_v55 }
 0x266   : > { %v3225_v42 = vadd.f32 %v3210_v13, %v2998_v49  ;;  %v2986_v59 = vpop.f32.mrf.mxu3 }
 0x267   : > { %3414 = vst [vmem:[#allocation4 + $0x8] sm:$0xff] %v3404_v14 }
 0x269   : > { %v2802_v62 = vpop.f32.mrf.mxu2 }
 0x26a   : > { %v2815_v53 = vadd.f32 %v2802_v62, %v5169_v52 }
 0x26b   : > { %v3215_v10 = vpop.f32.mrf.mxu0 }
 0x26c   : > { %v3383_v20 = vpop.f32.mrf.mxu1  ;;  %v2999_v15 = vadd.f32 %v2986_v59, %v2815_v53 }
 0x26d   : > { %v3405_v33 = vadd.f32 %v3383_v20, %v3220_v16 }
 0x26e   : > { %v3226_v6 = vadd.f32 %v3213_v35, %v2999_v15  ;;  %v2988_v56 = vpop.f32.mrf.mxu3 }
 0x26f   : > { %3415 = vst [vmem:[#allocation4 + $0x10] sm:$0xff] %v3405_v33 }
 0x271   : > { %v2804_v5 = vpop.f32.mrf.mxu2 }
 0x272   : > { %v2816_v54 = vadd.f32 %v2804_v5, %v5171_v4 }
 0x274   : > { %v3385_v28 = vpop.f32.mrf.mxu1  ;;  %v3000_v52 = vadd.f32 %v2988_v56, %v2816_v54 }
 0x275   : > { %v3406_v31 = vadd.f32 %v3385_v28, %v3221_v57 }
 0x276   : > { %v3425_v0 = vld [vmem:[#allocation4 + $0xa] sm:$0xff]  ;;  %v3227_v45 = vadd.f32 %v3215_v10, %v3000_v52 }
 0x277   : > { %3426 = vst [vmem:[%s5176_s9 + $0x8] sm:$0xff] %v3425_v0 }
 0x278   : > { %3416 = vst [vmem:[#allocation4 + $0x18] sm:$0xff] %v3406_v31 }
 0x27c   : > { %v3388_v38 = vpop.f32.mrf.mxu1 }
 0x27d   : > { %v3407_v46 = vadd.f32 %v3388_v38, %v3222_v36 }
 0x27f   : > { %v3427_v26 = vld [vmem:[#allocation4 + $0x14] sm:$0xff]  ;;  %3417 = vst [vmem:[#allocation4 + $0x20] sm:$0xff] %v3407_v46 }
 0x280   : > { %3428 = vst [vmem:[%s5176_s9 + $0x10] sm:$0xff] %v3427_v26 }
 0x284   : > { %v3390_v58 = vpop.f32.mrf.mxu1 }
 0x285   : > { %v3408_v44 = vadd.f32 %v3390_v58, %v3223_v7 }
 0x286   : > { %v3429_v25 = vld [vmem:[#allocation4 + $0x1e] sm:$0xff] }
 0x287   : > { %3430 = vst [vmem:[%s5176_s9 + $0x18] sm:$0xff] %v3429_v25 }
 0x288   : > { %3432 = vst [vmem:[%s5176_s9 + $0x20] sm:$0xff] %v3408_v44 }
 0x28c   : > { %v3393_v8 = vpop.f32.mrf.mxu1 }
 0x28d   : > { %v3409_v29 = vadd.f32 %v3393_v8, %v3224_v3 }
 0x28f   : > { %3419 = vst [vmem:[#allocation4 + $0x30] sm:$0xff] %v3409_v29 }
 0x294   : > { %v3395_v63 = vpop.f32.mrf.mxu1 }
 0x295   : > { %v3410_v12 = vadd.f32 %v3395_v63, %v3225_v42 }
 0x297   : > { %3420 = vst [vmem:[#allocation4 + $0x38] sm:$0xff] %v3410_v12 }
 0x29c   : > { %v3398_v51 = vpop.f32.mrf.mxu1 }
 0x29d   : > { %v3411_v50 = vadd.f32 %v3398_v51, %v3226_v6 }
 0x29e   : > { %v3433_v9 = vld [vmem:[#allocation4 + $0x32] sm:$0xff] }
 0x29f   : > { %3434 = vst [vmem:[%s5176_s9 + $0x28] sm:$0xff] %v3433_v9 }
 0x2a0   : > { %3421 = vst [vmem:[#allocation4 + $0x40] sm:$0xff] %v3411_v50 }
 0x2a4   : > { %v3400_v55 = vpop.f32.mrf.mxu1 }
 0x2a5   : > { %v3412_v41 = vadd.f32 %v3400_v55, %v3227_v45 }
 0x2a7   : > { %v3435_v4 = vld [vmem:[#allocation4 + $0x3c] sm:$0xff]  ;;  %3422 = vst [vmem:[#allocation4 + $0x48] sm:$0xff] %v3412_v41 }
 0x2a8   : > { %3436 = vst [vmem:[%s5176_s9 + $0x30] sm:$0xff] %v3435_v4 }
 0x2ae   : > { %v3437_v34 = vld [vmem:[#allocation4 + $0x46] sm:$0xff] }
 0x2af   : > { %3438 = vst [vmem:[%s5176_s9 + $0x38] sm:$0xff] %v3437_v34 }
 0x2b0   : > { %4551 = shalt.err (!%p4548_p8)
}
 0x2b1   : > { %s4596_s7 = smov 128   ;;  %s4597_s8 = smov 8  }
 0x2b2   : > { %4441 = dma.vmem_to_hbm [thread:$0]  (%p4666_p5), %s3453_s14, 1024, %s3455_s15, %s3440_s16, %s4596_s7, %s4596_s7, %s4597_s8  }
 0x2b3 PF: > { %p4453_p9 = scmp.ge.s32.totalorder %s4590_s21, 2  ;;  %s3469_s9 = sand.u32 1, %s4578_s18  }
 0x2b4   : > { %s3470_s10 = scalar_lea.sflag [#allocation7], %s3469_s9 }
 0x2b5   : > { %p4448_p10 = pnand %p4453_p9, %p4670_p6 }
 0x2b7   : > { %p4449_p11 = pneg %p4448_p10 }
 0x2b9   : > { %4573 = dma.done.wait (%p4449_p11), %s3470_s10, 1024  }
 0x2ba   : > { %4575 = vsyncadd (%p4449_p11), %s3470_s10, 4294966272  ;;  %p16_p12 = scmp.ge.s32.totalorder %s4653_s24, 4   ;;  %s5248_s18 = smov %s4582_s19 }
 0x2bb   : > { %s5249_s19 = smov %s4586_s20  ;;  %s5250_s20 = smov %s4664_s27 }
 0x2bc   : > { %s5251_s21 = smov %s4653_s24  ;;  %18 = sbr.rel (!%p16_p12) target bundleno = 4 (0x4), region = 99 }
 0x2c1   :  { %3476 = vsyncpa [#allocation6], 1 }
 0x2c2   :  { %3478 = vsyncpa [#allocation6 + $0x1], 1 }
 0x2c3   :  { %3479 = vsyncpa [#allocation7], 1 }
 0x2c4   :  { %3481 = vsyncpa [#allocation7 + $0x1], 1 }

</bundles_post_ra>
